<compile_context>
chip_gen: v5e
topology: v5e:2x2
jax: 0.10.0
libtpu: 0.0.40
codegen_flags: <defaults>
</compile_context>

<pallas_src>
import jax
import jax.numpy as jnp
from jax.experimental import pallas as pl
from jax.experimental.pallas import tpu as pltpu

IN_DIM = 28 * 28            # 784
H1, H2, H3, OUT = 128, 64, 32, 10

# lane-friendly padded feature dims for the (resident) weights / biases
H1_PAD, H2_PAD, H3_PAD, OUT_PAD = 128, 128, 128, 128


def _pad2(a, rows, cols):
    return jnp.pad(a, ((0, rows - a.shape[0]), (0, cols - a.shape[1])))


def _pick_tb(batch):
    """Largest TB in {512, 384, 256, 128} that still gives >= 2 grid steps
    (keeps both v7x TensorCores busy via the parallel batch axis) while
    amortizing per-grid-step overhead for large batches."""
    tb = 512
    while tb > 128 and pl.cdiv(batch, tb) < 2:
        tb -= 128
    return tb


def mlp_kernel(x_ref,
               w1_ref, b1_ref,
               w2_ref, b2_ref,
               w3_ref, b3_ref,
               w4_ref, b4_ref,
               o_ref):
    # x tile: (TB, 784) f32 straight from HBM; cast to bf16 in-kernel (VPU
    # slack) so every jnp.dot feeds the MXU bf16 inputs with f32 accumulate.
    x = x_ref[...].astype(jnp.bfloat16)

    # fc1 + relu
    h = jnp.dot(x, w1_ref[...], preferred_element_type=jnp.float32) + b1_ref[...]
    h = jnp.maximum(h, 0.0)

    # fc2 + relu
    h = jnp.dot(h.astype(jnp.bfloat16), w2_ref[...],
                preferred_element_type=jnp.float32) + b2_ref[...]
    h = jnp.maximum(h, 0.0)

    # fc3 + relu
    h = jnp.dot(h.astype(jnp.bfloat16), w3_ref[...],
                preferred_element_type=jnp.float32) + b3_ref[...]
    h = jnp.maximum(h, 0.0)

    # fc4
    logits = jnp.dot(h.astype(jnp.bfloat16), w4_ref[...],
                     preferred_element_type=jnp.float32) + b4_ref[...]

    # Mask padded output lanes (col >= OUT) so they don't perturb log_softmax.
    col = jax.lax.broadcasted_iota(jnp.int32, logits.shape, dimension=1)
    logits = jnp.where(col < OUT, logits, jnp.float32(-1e30))

    # numerically stable log_softmax over the last axis
    m = jnp.max(logits, axis=-1, keepdims=True)
    s = logits - m
    lse = jnp.log(jnp.sum(jnp.exp(s), axis=-1, keepdims=True))
    o_ref[...] = (s - lse).astype(o_ref.dtype)


def net_forward(x, params, tb=None):
    """x: (B, 784) float32; params: weights (in, out) & biases (1, out) f32."""
    B = x.shape[0]
    if tb is None:
        tb = _pick_tb(B)

    # One-time layout plumbing for the *resident* operands only: pad hidden /
    # output feature dims to 128 lanes, cast matmul weights to bf16 (biases
    # stay f32).  x is passed through untouched.
    w1 = _pad2(params["w1"], IN_DIM, H1_PAD).astype(jnp.bfloat16)
    w2 = _pad2(params["w2"], H1_PAD, H2_PAD).astype(jnp.bfloat16)
    w3 = _pad2(params["w3"], H2_PAD, H3_PAD).astype(jnp.bfloat16)
    w4 = _pad2(params["w4"], H3_PAD, OUT_PAD).astype(jnp.bfloat16)
    b1 = _pad2(params["b1"], 1, H1_PAD).astype(jnp.float32)
    b2 = _pad2(params["b2"], 1, H2_PAD).astype(jnp.float32)
    b3 = _pad2(params["b3"], 1, H3_PAD).astype(jnp.float32)
    b4 = _pad2(params["b4"], 1, OUT_PAD).astype(jnp.float32)

    grid = (pl.cdiv(B, tb),)

    # block last dim == full array dim (784) -> legal even though 784 % 128 != 0
    x_spec = pl.BlockSpec((tb, IN_DIM), lambda i: (i, 0))
    out_spec = pl.BlockSpec((tb, OUT_PAD), lambda i: (i, 0))

    def resident(shape):
        # weights/biases: same block every grid step -> stay VMEM-resident.
        return pl.BlockSpec(shape, lambda i: (0, 0))

    flops = 2 * B * (IN_DIM * H1_PAD + H1_PAD * H2_PAD
                     + H2_PAD * H3_PAD + H3_PAD * OUT_PAD)
    bytes_accessed = (x.size * 4
                      + (w1.size + w2.size + w3.size + w4.size) * 2
                      + (b1.size + b2.size + b3.size + b4.size) * 4
                      + B * OUT_PAD * 4)

    out = pl.pallas_call(
        mlp_kernel,
        out_shape=jax.ShapeDtypeStruct((B, OUT_PAD), jnp.float32),
        grid=grid,
        in_specs=[
            x_spec,
            resident((IN_DIM, H1_PAD)), resident((1, H1_PAD)),
            resident((H1_PAD, H2_PAD)), resident((1, H2_PAD)),
            resident((H2_PAD, H3_PAD)), resident((1, H3_PAD)),
            resident((H3_PAD, OUT_PAD)), resident((1, OUT_PAD)),
        ],
        out_specs=out_spec,
        compiler_params=pltpu.CompilerParams(
            dimension_semantics=("parallel",)),
        cost_estimate=pl.CostEstimate(
            flops=int(flops),
            transcendentals=int(B * OUT_PAD),
            bytes_accessed=int(bytes_accessed)),
    )(x, w1, b1, w2, b2, w3, b3, w4, b4)

    # slice off the padded logit lanes
    return out[:B, :OUT]


def init_params(key):
    """Deterministic Kaiming-uniform-ish init mirroring nn.Linear shapes."""
    dims = [(IN_DIM, H1), (H1, H2), (H2, H3), (H3, OUT)]
    params = {}
    keys = jax.random.split(key, 2 * len(dims))
    for i, (din, dout) in enumerate(dims):
        bound = 1.0 / jnp.sqrt(jnp.float32(din))
        w = jax.random.uniform(keys[2 * i], (din, dout), jnp.float32, -bound, bound)
        b = jax.random.uniform(keys[2 * i + 1], (1, dout), jnp.float32, -bound, bound)
        params[f"w{i + 1}"] = w
        params[f"b{i + 1}"] = b
    return params


if __name__ == "__main__":
    key = jax.random.PRNGKey(0)
    k_param, k_x = jax.random.split(key)

    params = init_params(k_param)

    B = 256                       # -> TB=128, 2 grid steps (one per v7x core)
    x = jax.random.normal(k_x, (B, IN_DIM), jnp.float32)

    out = net_forward(x, params)
    out = jax.block_until_ready(out)

    # Reference with the same bf16-matmul / f32-accumulate numerics.
    def ref(xv, p):
        def lin(h, w, b):
            return jnp.dot(h.astype(jnp.bfloat16), w.astype(jnp.bfloat16),
                           preferred_element_type=jnp.float32) + b
        h = jnp.maximum(lin(xv, p["w1"], p["b1"]), 0.0)
        h = jnp.maximum(lin(h, p["w2"], p["b2"]), 0.0)
        h = jnp.maximum(lin(h, p["w3"], p["b3"]), 0.0)
        logits = lin(h, p["w4"], p["b4"])
        return jax.nn.log_softmax(logits, axis=1)

    expected = ref(x, params)
    assert out.shape == (B, OUT)
    assert jnp.allclose(out, expected, atol=1e-4, rtol=1e-4), (
        float(jnp.max(jnp.abs(out - expected))))

    print("KERNEL_OK")
</pallas_src>

<mosaic_0001>
module attributes {stable_mosaic.version = 11 : i64} {
  func.func @mlp_kernel(%arg0: i32, %arg1: memref<128x784xf32, #tpu.memory_space<vmem>>, %arg2: memref<784x128xbf16, #tpu.memory_space<vmem>>, %arg3: memref<1x128xf32, #tpu.memory_space<vmem>>, %arg4: memref<128x128xbf16, #tpu.memory_space<vmem>>, %arg5: memref<1x128xf32, #tpu.memory_space<vmem>>, %arg6: memref<128x128xbf16, #tpu.memory_space<vmem>>, %arg7: memref<1x128xf32, #tpu.memory_space<vmem>>, %arg8: memref<128x128xbf16, #tpu.memory_space<vmem>>, %arg9: memref<1x128xf32, #tpu.memory_space<vmem>>, %arg10: memref<128x128xf32, #tpu.memory_space<vmem>>) attributes {dimension_semantics = [#tpu.dimension_semantics<parallel>], iteration_bounds = array<i64: 2>, scalar_prefetch = 0 : i64, scratch_operands = 0 : i64, tpu.core_type = #tpu.core_type<tc>, window_params = [{transform_indices = @transform_0, window_bounds = array<i64: 128, 784>}, {pipeline_mode = #tpu.pipeline_mode<synchronous>, transform_indices = @transform_1, window_bounds = array<i64: 784, 128>}, {pipeline_mode = #tpu.pipeline_mode<synchronous>, transform_indices = @transform_2, window_bounds = array<i64: 1, 128>}, {pipeline_mode = #tpu.pipeline_mode<synchronous>, transform_indices = @transform_3, window_bounds = array<i64: 128, 128>}, {pipeline_mode = #tpu.pipeline_mode<synchronous>, transform_indices = @transform_4, window_bounds = array<i64: 1, 128>}, {pipeline_mode = #tpu.pipeline_mode<synchronous>, transform_indices = @transform_5, window_bounds = array<i64: 128, 128>}, {pipeline_mode = #tpu.pipeline_mode<synchronous>, transform_indices = @transform_6, window_bounds = array<i64: 1, 128>}, {pipeline_mode = #tpu.pipeline_mode<synchronous>, transform_indices = @transform_7, window_bounds = array<i64: 128, 128>}, {pipeline_mode = #tpu.pipeline_mode<synchronous>, transform_indices = @transform_8, window_bounds = array<i64: 1, 128>}, {transform_indices = @transform_9, window_bounds = array<i64: 128, 128>}]} {
    %c0 = arith.constant 0 : index
    %c0_0 = arith.constant 0 : index
    %0 = vector.load %arg1[%c0, %c0_0] : memref<128x784xf32, #tpu.memory_space<vmem>>, vector<128x784xf32>
    %1 = arith.truncf %0 : vector<128x784xf32> to vector<128x784xbf16>
    %c0_1 = arith.constant 0 : index
    %c0_2 = arith.constant 0 : index
    %2 = vector.load %arg2[%c0_1, %c0_2] : memref<784x128xbf16, #tpu.memory_space<vmem>>, vector<784x128xbf16>
    %cst = arith.constant dense<0.000000e+00> : vector<128x128xf32>
    %3 = tpu.matmul %1, %2, %cst {dimension_numbers = #tpu.dot_dimension_numbers<[1], [0], [0], [1], [0, 0, 1, 1], [], []>} : vector<128x784xbf16>, vector<784x128xbf16>, vector<128x128xf32> -> vector<128x128xf32>
    %c0_3 = arith.constant 0 : index
    %c0_4 = arith.constant 0 : index
    %4 = vector.load %arg3[%c0_3, %c0_4] : memref<1x128xf32, #tpu.memory_space<vmem>>, vector<1x128xf32>
    %5 = vector.broadcast %4 : vector<1x128xf32> to vector<128x128xf32>
    %6 = arith.addf %3, %5 : vector<128x128xf32>
    %cst_5 = arith.constant 0.000000e+00 : f32
    %7 = vector.broadcast %cst_5 : f32 to vector<128x128xf32>
    %8 = arith.maximumf %6, %7 : vector<128x128xf32>
    %9 = arith.truncf %8 : vector<128x128xf32> to vector<128x128xbf16>
    %c0_6 = arith.constant 0 : index
    %c0_7 = arith.constant 0 : index
    %10 = vector.load %arg4[%c0_6, %c0_7] : memref<128x128xbf16, #tpu.memory_space<vmem>>, vector<128x128xbf16>
    %cst_8 = arith.constant dense<0.000000e+00> : vector<128x128xf32>
    %11 = tpu.matmul %9, %10, %cst_8 {dimension_numbers = #tpu.dot_dimension_numbers<[1], [0], [0], [1], [0, 0, 1, 1], [], []>} : vector<128x128xbf16>, vector<128x128xbf16>, vector<128x128xf32> -> vector<128x128xf32>
    %c0_9 = arith.constant 0 : index
    %c0_10 = arith.constant 0 : index
    %12 = vector.load %arg5[%c0_9, %c0_10] : memref<1x128xf32, #tpu.memory_space<vmem>>, vector<1x128xf32>
    %13 = vector.broadcast %12 : vector<1x128xf32> to vector<128x128xf32>
    %14 = arith.addf %11, %13 : vector<128x128xf32>
    %cst_11 = arith.constant 0.000000e+00 : f32
    %15 = vector.broadcast %cst_11 : f32 to vector<128x128xf32>
    %16 = arith.maximumf %14, %15 : vector<128x128xf32>
    %17 = arith.truncf %16 : vector<128x128xf32> to vector<128x128xbf16>
    %c0_12 = arith.constant 0 : index
    %c0_13 = arith.constant 0 : index
    %18 = vector.load %arg6[%c0_12, %c0_13] : memref<128x128xbf16, #tpu.memory_space<vmem>>, vector<128x128xbf16>
    %cst_14 = arith.constant dense<0.000000e+00> : vector<128x128xf32>
    %19 = tpu.matmul %17, %18, %cst_14 {dimension_numbers = #tpu.dot_dimension_numbers<[1], [0], [0], [1], [0, 0, 1, 1], [], []>} : vector<128x128xbf16>, vector<128x128xbf16>, vector<128x128xf32> -> vector<128x128xf32>
    %c0_15 = arith.constant 0 : index
    %c0_16 = arith.constant 0 : index
    %20 = vector.load %arg7[%c0_15, %c0_16] : memref<1x128xf32, #tpu.memory_space<vmem>>, vector<1x128xf32>
    %21 = vector.broadcast %20 : vector<1x128xf32> to vector<128x128xf32>
    %22 = arith.addf %19, %21 : vector<128x128xf32>
    %cst_17 = arith.constant 0.000000e+00 : f32
    %23 = vector.broadcast %cst_17 : f32 to vector<128x128xf32>
    %24 = arith.maximumf %22, %23 : vector<128x128xf32>
    %25 = arith.truncf %24 : vector<128x128xf32> to vector<128x128xbf16>
    %c0_18 = arith.constant 0 : index
    %c0_19 = arith.constant 0 : index
    %26 = vector.load %arg8[%c0_18, %c0_19] : memref<128x128xbf16, #tpu.memory_space<vmem>>, vector<128x128xbf16>
    %cst_20 = arith.constant dense<0.000000e+00> : vector<128x128xf32>
    %27 = tpu.matmul %25, %26, %cst_20 {dimension_numbers = #tpu.dot_dimension_numbers<[1], [0], [0], [1], [0, 0, 1, 1], [], []>} : vector<128x128xbf16>, vector<128x128xbf16>, vector<128x128xf32> -> vector<128x128xf32>
    %c0_21 = arith.constant 0 : index
    %c0_22 = arith.constant 0 : index
    %28 = vector.load %arg9[%c0_21, %c0_22] : memref<1x128xf32, #tpu.memory_space<vmem>>, vector<1x128xf32>
    %29 = vector.broadcast %28 : vector<1x128xf32> to vector<128x128xf32>
    %30 = arith.addf %27, %29 : vector<128x128xf32>
    %31 = tpu.iota {dimensions = array<i32: 1>} : vector<128x128xi32>
    %c10_i32 = arith.constant 10 : i32
    %32 = vector.broadcast %c10_i32 : i32 to vector<128x128xi32>
    %33 = arith.cmpi slt, %31, %32 : vector<128x128xi32>
    %cst_23 = arith.constant -1.000000e+30 : f32
    %34 = vector.broadcast %cst_23 : f32 to vector<128x128xf32>
    %35 = arith.select %33, %30, %34 : vector<128x128xi1>, vector<128x128xf32>
    %cst_24 = arith.constant dense<0xFF800000> : vector<128xf32>
    %36 = vector.multi_reduction <maximumf>, %35, %cst_24 [1] : vector<128x128xf32> to vector<128xf32>
    %37 = vector.shape_cast %36 : vector<128xf32> to vector<128x1xf32>
    %38 = vector.broadcast %37 : vector<128x1xf32> to vector<128x128xf32>
    %39 = arith.subf %35, %38 : vector<128x128xf32>
    %40 = math.exp %39 : vector<128x128xf32>
    %cst_25 = arith.constant dense<0.000000e+00> : vector<128xf32>
    %41 = vector.multi_reduction <add>, %40, %cst_25 [1] : vector<128x128xf32> to vector<128xf32>
    %42 = vector.shape_cast %41 : vector<128xf32> to vector<128x1xf32>
    %43 = math.log %42 : vector<128x1xf32>
    %44 = vector.broadcast %43 : vector<128x1xf32> to vector<128x128xf32>
    %45 = arith.subf %39, %44 : vector<128x128xf32>
    %c0_26 = arith.constant 0 : index
    %c0_27 = arith.constant 0 : index
    %46 = vector.load %arg10[%c0_26, %c0_27] : memref<128x128xf32, #tpu.memory_space<vmem>>, vector<128x128xf32>
    tpu.vector_store %arg10[%c0_26, %c0_27], %45 {strides = array<i32>} : memref<128x128xf32, #tpu.memory_space<vmem>>, vector<128x128xf32>,
    return
  }
  func.func @transform_0(%arg0: i32) -> (i32, i32) {
    %c0_i32 = arith.constant 0 : i32
    %c0_i32_0 = arith.constant 0 : i32
    return %arg0, %c0_i32 : i32, i32
  }
  func.func @transform_1(%arg0: i32) -> (i32, i32) {
    %c0_i32 = arith.constant 0 : i32
    %c0_i32_0 = arith.constant 0 : i32
    %c0_i32_1 = arith.constant 0 : i32
    return %c0_i32, %c0_i32_0 : i32, i32
  }
  func.func @transform_2(%arg0: i32) -> (i32, i32) {
    %c0_i32 = arith.constant 0 : i32
    %c0_i32_0 = arith.constant 0 : i32
    %c0_i32_1 = arith.constant 0 : i32
    return %c0_i32, %c0_i32_0 : i32, i32
  }
  func.func @transform_3(%arg0: i32) -> (i32, i32) {
    %c0_i32 = arith.constant 0 : i32
    %c0_i32_0 = arith.constant 0 : i32
    %c0_i32_1 = arith.constant 0 : i32
    return %c0_i32, %c0_i32_0 : i32, i32
  }
  func.func @transform_4(%arg0: i32) -> (i32, i32) {
    %c0_i32 = arith.constant 0 : i32
    %c0_i32_0 = arith.constant 0 : i32
    %c0_i32_1 = arith.constant 0 : i32
    return %c0_i32, %c0_i32_0 : i32, i32
  }
  func.func @transform_5(%arg0: i32) -> (i32, i32) {
    %c0_i32 = arith.constant 0 : i32
    %c0_i32_0 = arith.constant 0 : i32
    %c0_i32_1 = arith.constant 0 : i32
    return %c0_i32, %c0_i32_0 : i32, i32
  }
  func.func @transform_6(%arg0: i32) -> (i32, i32) {
    %c0_i32 = arith.constant 0 : i32
    %c0_i32_0 = arith.constant 0 : i32
    %c0_i32_1 = arith.constant 0 : i32
    return %c0_i32, %c0_i32_0 : i32, i32
  }
  func.func @transform_7(%arg0: i32) -> (i32, i32) {
    %c0_i32 = arith.constant 0 : i32
    %c0_i32_0 = arith.constant 0 : i32
    %c0_i32_1 = arith.constant 0 : i32
    return %c0_i32, %c0_i32_0 : i32, i32
  }
  func.func @transform_8(%arg0: i32) -> (i32, i32) {
    %c0_i32 = arith.constant 0 : i32
    %c0_i32_0 = arith.constant 0 : i32
    %c0_i32_1 = arith.constant 0 : i32
    return %c0_i32, %c0_i32_0 : i32, i32
  }
  func.func @transform_9(%arg0: i32) -> (i32, i32) {
    %c0_i32 = arith.constant 0 : i32
    %c0_i32_0 = arith.constant 0 : i32
    return %arg0, %c0_i32 : i32, i32
  }
}

</mosaic_0001>

<bundles_post_ra>
// kernel: tpu_custom_call.1
= control target key start
LH: loop header
LB: loop body
LE: loop exit
PB: predicated region body
PF: predicated region fallthrough
CT: control target
= control target key end

     0   :  { %14 = vsyncpa [#allocation3], 0  ;;  %s3381_s0 = inlined_call_operand.vmem [shape: f32[256,784], index: 0, kind: input, shape index: {}]   ;;  %s3382_s1 = inlined_call_operand.vmem [shape: bf16[784,128], index: 1, kind: input, shape index: {}]   ;;  %s3383_s2 = inlined_call_operand.vmem [shape: f32[1,128], index: 2, kind: input, shape index: {}]   ;;  %s3384_s3 = inlined_call_operand.vmem [shape: bf16[128,128], index: 3, kind: input, shape index: {}]   ;;  %s3385_s4 = inlined_call_operand.vmem [shape: f32[1,128], index: 4, kind: input, shape index: {}]   ;;  %s3386_s5 = inlined_call_operand.vmem [shape: bf16[128,128], index: 5, kind: input, shape index: {}]   ;;  %s3387_s6 = inlined_call_operand.vmem [shape: f32[1,128], index: 6, kind: input, shape index: {}]   ;;  %s3388_s7 = inlined_call_operand.vmem [shape: bf16[128,128], index: 7, kind: input, shape index: {}]   ;;  %s3389_s8 = inlined_call_operand.vmem [shape: f32[1,128], index: 8, kind: input, shape index: {}]   ;;  %s3390_s9 = inlined_call_operand.hbm [shape: f32[256,128], index: 9, kind: output, shape index: {}]  }
   0x1   :  { %16 = vsyncpa [#allocation3 + $0x1], 0  ;;  %s2594_s30 = smov 0   ;;  %s2596_s10 = smov 0  }
   0x2   :  { %s2598_s11 = smov 0   ;;  %s2600_s12 = smov 0  }
   0x3 LB: > { %s2615_s13 = sadd.s32 4294967295, %s2540_s12   ;;  %s1966_s14 = sadd.s32 4294967294, %s2540_s12   ;;  %s2540_s12 = sphi %s2600_s12, %s3396_s12   ;;  %s2536_s11 = sphi %s2598_s11, %s3395_s11   ;;  %s2532_s10 = sphi %s2596_s10, %s3394_s10   ;;  %s2528_s30 = sphi %s2594_s30, %s3393_s30  }
   0x4   : > { %s2619_s15 = sadd.s32 1, %s2540_s12   ;;  %s223_s16 = sadd.s32 1, %s2536_s11 }
   0x5   : > { %s220_s17 = ssub.s32 %s2540_s12, %s2619_s15  ;;  %p233_p0 = scmp.ne.s32.totalorder %s2536_s11, %s2532_s10 }
   0x6   : > { %p221_p1 = scmp.eq.s32.totalorder %s220_s17, 0  ;;  %p234_p2 = scmp.eq.s32.totalorder %s2615_s13, 1 }
   0x7   : > { %p239_p3 = scmp.ne.s32.totalorder %s2532_s10, %s2528_s30  ;;  %p240_p4 = scmp.eq.s32.totalorder %s1966_s14, 1 }
   0x8   : > { %s2630_s18 = scalar_select %p221_p1, %s2536_s11, %s223_s16  }
   0x9   : > { %p2632_p5 = por %p234_p2, %p233_p0  ;;  %p2636_p6 = por %p240_p4, %p239_p3 }
   0xa   : > { %p1969_p7 = scmp.ge.s32.totalorder %s2540_s12, 1  ;;  %p292_p8 = scmp.lt.s32.totalorder %s2540_s12, 3 }
   0xc   : > { %p293_p9 = pnand %p1969_p7, %p292_p8 }
   0xd   : > { %s1971_s21 = sshll.u32 (!%p293_p9), %s2615_s13, 4  ;;  %s326_s16 = sand.u32 (!%p293_p9), 1, %s2532_s10  }
   0xe   : > { %296 = sbr.rel (%p293_p9) target bundleno = 1182 (0x49e), region = 56  ;;  %p330_p10 = scmp.lt.s32.totalorder (!%p293_p9), %s1971_s21, 31 }
   0xf   : > { %s1970_s17 = sshll.u32 (!%p293_p9), %s326_s16, 7 }
  0x10   : > { %s3314_s22 = scalar_lea.vmem (!%p293_p9), [#allocation2], %s1970_s17 }
  0x11   : > { %s1901_s27 = sshll.u32 (!%p293_p9), %s3314_s22, 4  ;;  %s1902_s27 = int_to_ptr.vmem [resolvable:$true] %s1901_s27 }
  0x13   : > { %v2285_v0 = vld [vmem:[%s3382_s1 + $0x38] sm:$0xff]  ;;  %v2284_v2 = vld [vmem:[%s3382_s1 + $0x30] sm:$0xff]  ;;  %v2283_v4 = vld [vmem:[%s3382_s1 + $0x28] sm:$0xff]  ;;  %s3398_s21 = smov (!%p330_p10, %s1971_s21), 31  ;;  %vm902_vm0 = vcmask 130048  }
  0x14   : > { %v2293_v1 = vld [vmem:[%s3382_s1 + $0x78] sm:$0xff]  ;;  %2352 = vmatpush.bf16.msra.mxu2 %v2285_v0  ;;  %v2292_v3 = vld [vmem:[%s3382_s1 + $0x70] sm:$0xff]  ;;  %927 = vmatpush.bf16.msra.mxu0 %v2285_v0  ;;  %v2291_v5 = vld [vmem:[%s3382_s1 + $0x68] sm:$0xff]  ;;  %s2368_s23 = smul.u32 56, %s3398_s21 }
  0x15   : > { %2360 = vmatpush.bf16.msra.mxu3 %v2293_v1  ;;  %976 = vmatpush.bf16.msra.mxu1 %v2293_v1  ;;  %v2282_v6 = vld [vmem:[%s3382_s1 + $0x20] sm:$0xff]  ;;  %v2281_v8 = vld [vmem:[%s3382_s1 + $0x18] sm:$0xff]  ;;  %v2280_v10 = vld [vmem:[%s3382_s1 + $0x10] sm:$0xff] }
  0x16   : > { %v2290_v7 = vld [vmem:[%s3382_s1 + $0x60] sm:$0xff]  ;;  %v2289_v9 = vld [vmem:[%s3382_s1 + $0x58] sm:$0xff]  ;;  %v2288_v11 = vld [vmem:[%s3382_s1 + $0x50] sm:$0xff]  ;;  %s2688_s14 = scalar_lea.vmem %s3381_s0, %s2368_s23  ;;  %s2351_s23 = sshll.u32 %s2615_s13, 7 }
  0x17   : > { %v2279_v12 = vld [vmem:[%s3382_s1 + $0x8] sm:$0xff]  ;;  %v2278_v14 = vld [vmem:[%s3382_s1] sm:$0xff]  ;;  %v401_v17 = vld [vmem:[%s2688_s14 + $0x1f8] sm:$0xff]  ;;  %s1900_s26 = scalar_lea.hbm %s3390_s9, %s2351_s23  ;;  %s1889_s13 = scalar_lea.sflag [#allocation3], %s326_s16 }
  0x18   : > { %2353 = vmatpush.bf16.msra.mxu2 %v2284_v2  ;;  %928 = vmatpush.bf16.msra.mxu0 %v2284_v2  ;;  %v2287_v13 = vld [vmem:[%s3382_s1 + $0x48] sm:$0xff]  ;;  %v2286_v15 = vld [vmem:[%s3382_s1 + $0x40] sm:$0xff]  ;;  %v2301_v20 = vld [vmem:[%s3382_s1 + $0xb8] sm:$0xff]  ;;  %s1903_s28 = sshll.u32 %s1900_s26, 4  ;;  %s2498_s23 = scalar_lea.hbm %s3390_s9, 256  ;;  %s1904_s28 = int_to_ptr.hbm [resolvable:$true] %s1903_s28 }
  0x19   : > { %2361 = vmatpush.bf16.msra.mxu3 %v2292_v3  ;;  %977 = vmatpush.bf16.msra.mxu1 %v2292_v3  ;;  %v394_v16 = vld [vmem:[%s2688_s14 + $0x1c0] sm:$0xff]  ;;  %v395_v18 = vld [vmem:[%s2688_s14 + $0x1c8] sm:$0xff]  ;;  %v345_v22 = vld [vmem:[%s2688_s14 + $0x38] sm:$0xff]  ;;  %s2492_s29 = sshra.s32 %s1904_s28, 4  ;;  %s2493_s29 = int_to_ptr.hbm [resolvable:$true] %s2492_s29 }
  0x1a   : > { %v402_v19 = vld [vmem:[%s2688_s14 + $0x200] sm:$0xff]  ;;  %v339_v23 = vld [vmem:[%s2688_s14 + $0x8] sm:$0xff]  ;;  %v478_v25 = vpack.c.bf16 %v401_v17, %v394_v16  ;;  %v2300_v28 = vld [vmem:[%s3382_s1 + $0xb0] sm:$0xff]  ;;  %p2499_p0 = scmp.lt.s32.totalorder %s2493_s29, %s3390_s9 }
  0x1b   : > { %v338_v21 = vld [vmem:[%s2688_s14] sm:$0xff]  ;;  %v479_v26 = vpack.c.bf16 %v402_v19, %v395_v18  ;;  %v2309_v30 = vld [vmem:[%s3382_s1 + $0xf8] sm:$0xff]  ;;  %v2299_v31 = vld [vmem:[%s3382_s1 + $0xa8] sm:$0xff] }
  0x1c   : > { %2354 = vmatpush.bf16.msra.mxu2 %v2283_v4  ;;  %929 = vmatpush.bf16.msra.mxu0 %v2283_v4  ;;  %v346_v24 = vld [vmem:[%s2688_s14 + $0x40] sm:$0xff]  ;;  %v450_v27 = vpack.c.bf16 %v345_v22, %v338_v21  ;;  %v2317_v32 = vld [vmem:[%s3382_s1 + $0x138] sm:$0xff]  ;;  %v2308_v33 = vld [vmem:[%s3382_s1 + $0xf0] sm:$0xff] }
  0x1d   : > { %2362 = vmatpush.bf16.msra.mxu3 %v2291_v5  ;;  %978 = vmatpush.bf16.msra.mxu1 %v2291_v5  ;;  %v451_v29 = vpack.c.bf16 %v346_v24, %v339_v23  ;;  %v2325_v34 = vld [vmem:[%s3382_s1 + $0x178] sm:$0xff]  ;;  %v2316_v35 = vld [vmem:[%s3382_s1 + $0x130] sm:$0xff]  ;;  %v2298_v36 = vld [vmem:[%s3382_s1 + $0xa0] sm:$0xff] }
  0x1e   : > { %v2307_v37 = vld [vmem:[%s3382_s1 + $0xe8] sm:$0xff]  ;;  %v408_v38 = vld [vmem:[%s2688_s14 + $0x230] sm:$0xff]  ;;  %v409_v40 = vld [vmem:[%s2688_s14 + $0x238] sm:$0xff] }
  0x1f   : > { %v415_v39 = vld [vmem:[%s2688_s14 + $0x268] sm:$0xff]  ;;  %v416_v41 = vld [vmem:[%s2688_s14 + $0x270] sm:$0xff]  ;;  %v2297_v44 = vld [vmem:[%s3382_s1 + $0x98] sm:$0xff] }
  0x20   : > { %2355 = vmatpush.bf16.msra.mxu2 %v2282_v6  ;;  %930 = vmatpush.bf16.msra.mxu0 %v2282_v6  ;;  %v352_v42 = vld [vmem:[%s2688_s14 + $0x70] sm:$0xff]  ;;  %v359_v43 = vld [vmem:[%s2688_s14 + $0xa8] sm:$0xff]  ;;  %v353_v45 = vld [vmem:[%s2688_s14 + $0x78] sm:$0xff]  ;;  %v485_v48 = vpack.c.bf16 %v415_v39, %v408_v38  ;;  %v486_v49 = vpack.c.bf16 %v416_v41, %v409_v40 }
  0x21   : > { %2363 = vmatpush.bf16.msra.mxu3 %v2290_v7  ;;  %979 = vmatpush.bf16.msra.mxu1 %v2290_v7  ;;  %v360_v46 = vld [vmem:[%s2688_s14 + $0xb0] sm:$0xff]  ;;  %v2306_v47 = vld [vmem:[%s3382_s1 + $0xe0] sm:$0xff]  ;;  %v457_v50 = vpack.c.bf16 %v359_v43, %v352_v42  ;;  %v2305_v54 = vld [vmem:[%s3382_s1 + $0xd8] sm:$0xff] }
  0x22   : > { %v458_v51 = vpack.c.bf16 %v360_v46, %v353_v45  ;;  %v2296_v52 = vld [vmem:[%s3382_s1 + $0x90] sm:$0xff]  ;;  %v2315_v55 = vld [vmem:[%s3382_s1 + $0x128] sm:$0xff]  ;;  %v2314_v59 = vld [vmem:[%s3382_s1 + $0x120] sm:$0xff] }
  0x23   : > { %v2324_v53 = vld [vmem:[%s3382_s1 + $0x170] sm:$0xff]  ;;  %v2323_v56 = vld [vmem:[%s3382_s1 + $0x168] sm:$0xff]  ;;  %v2322_v60 = vld [vmem:[%s3382_s1 + $0x160] sm:$0xff] }
  0x24   : > { %2356 = vmatpush.bf16.msra.mxu2 %v2281_v8  ;;  %931 = vmatpush.bf16.msra.mxu0 %v2281_v8  ;;  %v2295_v57 = vld [vmem:[%s3382_s1 + $0x88] sm:$0xff]  ;;  %v2304_v58 = vld [vmem:[%s3382_s1 + $0xd0] sm:$0xff]  ;;  %v2294_v61 = vld [vmem:[%s3382_s1 + $0x80] sm:$0xff] }
  0x25   : > { %2364 = vmatpush.bf16.msra.mxu3 %v2289_v9  ;;  %980 = vmatpush.bf16.msra.mxu1 %v2289_v9  ;;  %v2303_v62 = vld [vmem:[%s3382_s1 + $0xc8] sm:$0xff]  ;;  %v2313_v63 = vld [vmem:[%s3382_s1 + $0x118] sm:$0xff]  ;;  %v422_v0 = vld [vmem:[%s2688_s14 + $0x2a0] sm:$0xff] }
  0x26   : > { %v429_v1 = vld [vmem:[%s2688_s14 + $0x2d8] sm:$0xff]  ;;  %v423_v2 = vld [vmem:[%s2688_s14 + $0x2a8] sm:$0xff]  ;;  %v430_v3 = vld [vmem:[%s2688_s14 + $0x2e0] sm:$0xff] }
  0x27   : > { %v2321_v4 = vld [vmem:[%s3382_s1 + $0x158] sm:$0xff]  ;;  %v366_v5 = vld [vmem:[%s2688_s14 + $0xe0] sm:$0xff]  ;;  %v367_v7 = vld [vmem:[%s2688_s14 + $0xe8] sm:$0xff] }
  0x28   : > { %2357 = vmatpush.bf16.msra.mxu2 %v2280_v10  ;;  %932 = vmatpush.bf16.msra.mxu0 %v2280_v10  ;;  %v373_v6 = vld [vmem:[%s2688_s14 + $0x118] sm:$0xff]  ;;  %v374_v8 = vld [vmem:[%s2688_s14 + $0x120] sm:$0xff]  ;;  %v2312_v10 = vld [vmem:[%s3382_s1 + $0x110] sm:$0xff] }
  0x29   : > { %2365 = vmatpush.bf16.msra.mxu3 %v2288_v11  ;;  %981 = vmatpush.bf16.msra.mxu1 %v2288_v11  ;;  %v2302_v9 = vld [vmem:[%s3382_s1 + $0xc0] sm:$0xff]  ;;  %v492_v11 = vpack.c.bf16 %v429_v1, %v422_v0  ;;  %v2311_v17 = vld [vmem:[%s3382_s1 + $0x108] sm:$0xff]  ;;  %v436_v21 = vld [vmem:[%s2688_s14 + $0x310] sm:$0xff] }
  0x2a   : > { %v2326_v16 = vld [vmem:[%s3382_s1 + $0x180] sm:$0xff]  ;;  %v2319_v18 = vld [vmem:[%s3382_s1 + $0x148] sm:$0xff]  ;;  %v437_v23 = vld [vmem:[%s2688_s14 + $0x318] sm:$0xff] }
  0x2b   : > { %v2310_v19 = vld [vmem:[%s3382_s1 + $0x100] sm:$0xff]  ;;  %v443_v22 = vld [vmem:[%s2688_s14 + $0x348] sm:$0xff]  ;;  %v444_v24 = vld [vmem:[%s2688_s14 + $0x350] sm:$0xff] }
  0x2c   : > { %2358 = vmatpush.bf16.msra.mxu2 %v2279_v12  ;;  %933 = vmatpush.bf16.msra.mxu0 %v2279_v12  ;;  %v493_v12 = vpack.c.bf16 %v430_v3, %v423_v2  ;;  %v349_v38 = vld [vmem:[%s2688_s14 + $0x58] sm:$0xff]  ;;  %v343_v39 = vld [vmem:[%s2688_s14 + $0x28] sm:$0xff]  ;;  %v350_v40 = vld [vmem:[%s2688_s14 + $0x60] sm:$0xff] }
  0x2d   : > { %2366 = vmatpush.bf16.msra.mxu3 %v2287_v13  ;;  %982 = vmatpush.bf16.msra.mxu1 %v2287_v13  ;;  %v464_v13 = vpack.c.bf16 %v373_v6, %v366_v5  ;;  %v354_v45 = vld [vmem:[%s2688_s14 + $0x80] sm:$0xff]  ;;  %v361_v46 = vld [vmem:[%s2688_s14 + $0xb8] sm:$0xff] }
  0x2e   : > { %v378_v0 = vld [vmem:[%s2688_s14 + $0x140] sm:$0xff]  ;;  %v389_v6 = vld [vmem:[%s2688_s14 + $0x198] sm:$0xff] }
  0x2f   : > { %v382_v5 = vld [vmem:[%s2688_s14 + $0x160] sm:$0xff] }
  0x30   : > { %2359 = vmatpush.bf16.msra.mxu2 %v2278_v14  ;;  %934 = vmatpush.bf16.msra.mxu0 %v2278_v14  ;;  %v465_v14 = vpack.c.bf16 %v374_v8, %v367_v7  ;;  %v383_v7 = vld [vmem:[%s2688_s14 + $0x168] sm:$0xff]  ;;  %v390_v8 = vld [vmem:[%s2688_s14 + $0x1a0] sm:$0xff] }
  0x31   : > { %2367 = vmatpush.bf16.msra.mxu3 %v2286_v15  ;;  %983 = vmatpush.bf16.msra.mxu1 %v2286_v15  ;;  %v2320_v15 = vld [vmem:[%s3382_s1 + $0x150] sm:$0xff] }
  0x33   : > { %955 = vmatmul.bf16.vlgmr.msra.gmra.mxu2 %v478_v25  ;;  %935 = vmatmul.bf16.vlgmr.msra.gmra.mxu0 %v450_v27  ;;  %v380_v25 = vld [vmem:[%s2688_s14 + $0x150] sm:$0xff]  ;;  %v381_v27 = vld [vmem:[%s2688_s14 + $0x158] sm:$0xff] }
  0x34   : > { %1025 = vmatpush.bf16.msrb.mxu2 %v2301_v20  ;;  %1004 = vmatmul.bf16.vlgmr.msra.gmra.mxu3 %v479_v26  ;;  %v2318_v20 = vld [vmem:[%s3382_s1 + $0x140] sm:$0xff]  ;;  %v387_v26 = vld [vmem:[%s2688_s14 + $0x188] sm:$0xff] }
  0x35   : > { %984 = vmatmul.bf16.vlgmr.msra.gmra.mxu1 %v451_v29  ;;  %1074 = vmatpush.bf16.msrb.mxu3 %v2309_v30  ;;  %v499_v29 = vpack.c.bf16 %v443_v22, %v436_v21  ;;  %v500_v30 = vpack.c.bf16 %v444_v24, %v437_v23  ;;  %v398_v21 = vld [vmem:[%s2688_s14 + $0x1e0] sm:$0xff]  ;;  %v405_v22 = vld [vmem:[%s2688_s14 + $0x218] sm:$0xff]  ;;  %v399_v23 = vld [vmem:[%s2688_s14 + $0x1e8] sm:$0xff] }
  0x36   : > { %1123 = vmatpush.bf16.msrb.mxu0 %v2317_v32  ;;  %1172 = vmatpush.bf16.msrb.mxu1 %v2325_v34  ;;  %v347_v34 = vld [vmem:[%s2688_s14 + $0x48] sm:$0xff]  ;;  %v406_v24 = vld [vmem:[%s2688_s14 + $0x220] sm:$0xff] }
  0x38   : > { %1026 = vmatpush.bf16.msrb.mxu2 %v2300_v28  ;;  %v388_v28 = vld [vmem:[%s2688_s14 + $0x190] sm:$0xff] }
  0x39   : > { %1075 = vmatpush.bf16.msrb.mxu3 %v2308_v33  ;;  %v472_v32 = vpack.c.bf16 %v388_v28, %v381_v27  ;;  %v340_v33 = vld [vmem:[%s2688_s14 + $0x10] sm:$0xff]  ;;  %v2870_v27 = vld [vmem:[%s3383_s2] ss:$0 sm:$0xff]  ;;  %v482_v28 = vpack.c.bf16 %v405_v22, %v398_v21 }
  0x3a   : > { %1124 = vmatpush.bf16.msrb.mxu0 %v2316_v35  ;;  %1173 = vmatpush.bf16.msrb.mxu1 %v2324_v53  ;;  %v341_v35 = vld [vmem:[%s2688_s14 + $0x18] sm:$0xff]  ;;  %v452_v41 = vpack.c.bf16 %v347_v34, %v340_v33  ;;  %v459_v53 = vpack.c.bf16 %v361_v46, %v354_v45  ;;  %v419_v45 = vld [vmem:[%s2688_s14 + $0x288] sm:$0xff] }
  0x3c   : > { %1027 = vmatpush.bf16.msrb.mxu2 %v2299_v31  ;;  %v471_v31 = vpack.c.bf16 %v387_v26, %v380_v25 }
  0x3d   : > { %1076 = vmatpush.bf16.msrb.mxu3 %v2307_v37  ;;  %v342_v37 = vld [vmem:[%s2688_s14 + $0x20] sm:$0xff] }
  0x3e   : > { %1125 = vmatpush.bf16.msrb.mxu0 %v2315_v55  ;;  %1174 = vmatpush.bf16.msrb.mxu1 %v2323_v56  ;;  %v454_v43 = vpack.c.bf16 %v349_v38, %v342_v37 }
  0x40   : > { %1028 = vmatpush.bf16.msrb.mxu2 %v2298_v36  ;;  %v348_v36 = vld [vmem:[%s2688_s14 + $0x50] sm:$0xff] }
  0x41   : > { %1077 = vmatpush.bf16.msrb.mxu3 %v2306_v47  ;;  %v453_v42 = vpack.c.bf16 %v348_v36, %v341_v35  ;;  %v355_v47 = vld [vmem:[%s2688_s14 + $0x88] sm:$0xff] }
  0x42   : > { %1126 = vmatpush.bf16.msrb.mxu0 %v2314_v59  ;;  %1175 = vmatpush.bf16.msrb.mxu1 %v2322_v60  ;;  %v369_v59 = vld [vmem:[%s2688_s14 + $0xf8] sm:$0xff]  ;;  %v376_v60 = vld [vmem:[%s2688_s14 + $0x130] sm:$0xff] }
  0x43   : > { %960 = vmatmul.bf16.gmra.mxu2 %v485_v48  ;;  %940 = vmatmul.bf16.gmra.mxu0 %v457_v50  ;;  %v362_v48 = vld [vmem:[%s2688_s14 + $0xc0] sm:$0xff]  ;;  %v363_v50 = vld [vmem:[%s2688_s14 + $0xc8] sm:$0xff]  ;;  %v467_v2 = vpack.c.bf16 %v376_v60, %v369_v59 }
  0x44   : > { %1029 = vmatpush.bf16.msrb.mxu2 %v2297_v44  ;;  %1009 = vmatmul.bf16.gmra.mxu3 %v486_v49  ;;  %v455_v44 = vpack.c.bf16 %v350_v40, %v343_v39  ;;  %v356_v49 = vld [vmem:[%s2688_s14 + $0x90] sm:$0xff]  ;;  %v410_v40 = vld [vmem:[%s2688_s14 + $0x240] sm:$0xff] }
  0x45   : > { %989 = vmatmul.bf16.gmra.mxu1 %v458_v51  ;;  %1078 = vmatpush.bf16.msrb.mxu3 %v2305_v54  ;;  %v357_v51 = vld [vmem:[%s2688_s14 + $0x98] sm:$0xff]  ;;  %v460_v54 = vpack.c.bf16 %v362_v48, %v355_v47  ;;  %v461_v55 = vpack.c.bf16 %v363_v50, %v356_v49  ;;  %v420_v49 = vld [vmem:[%s2688_s14 + $0x290] sm:$0xff] }
  0x46   : > { %1127 = vmatpush.bf16.msrb.mxu0 %v2313_v63  ;;  %1176 = vmatpush.bf16.msrb.mxu1 %v2321_v4  ;;  %v371_v63 = vld [vmem:[%s2688_s14 + $0x108] sm:$0xff]  ;;  %v413_v48 = vld [vmem:[%s2688_s14 + $0x258] sm:$0xff] }
  0x47   : > { %v469_v4 = vpack.c.bf16 %v378_v0, %v371_v63 }
  0x48   : > { %1030 = vmatpush.bf16.msrb.mxu2 %v2296_v52  ;;  %v364_v52 = vld [vmem:[%s2688_s14 + $0xd0] sm:$0xff] }
  0x49   : > { %1079 = vmatpush.bf16.msrb.mxu3 %v2304_v58  ;;  %v462_v56 = vpack.c.bf16 %v364_v52, %v357_v51  ;;  %v375_v58 = vld [vmem:[%s2688_s14 + $0x128] sm:$0xff] }
  0x4a   : > { %1128 = vmatpush.bf16.msrb.mxu0 %v2312_v10  ;;  %1177 = vmatpush.bf16.msrb.mxu1 %v2320_v15  ;;  %v391_v10 = vld [vmem:[%s2688_s14 + $0x1a8] sm:$0xff] }
  0x4c   : > { %1031 = vmatpush.bf16.msrb.mxu2 %v2295_v57  ;;  %v368_v57 = vld [vmem:[%s2688_s14 + $0xf0] sm:$0xff] }
  0x4d   : > { %1080 = vmatpush.bf16.msrb.mxu3 %v2303_v62  ;;  %v377_v62 = vld [vmem:[%s2688_s14 + $0x138] sm:$0xff]  ;;  %v466_v1 = vpack.c.bf16 %v375_v58, %v368_v57 }
  0x4e   : > { %1129 = vmatpush.bf16.msrb.mxu0 %v2311_v17  ;;  %1178 = vmatpush.bf16.msrb.mxu1 %v2319_v18  ;;  %v396_v17 = vld [vmem:[%s2688_s14 + $0x1d0] sm:$0xff]  ;;  %v403_v18 = vld [vmem:[%s2688_s14 + $0x208] sm:$0xff] }
  0x4f   : > { %v480_v25 = vpack.c.bf16 %v403_v18, %v396_v17 }
  0x50   : > { %1032 = vmatpush.bf16.msrb.mxu2 %v2294_v61  ;;  %v370_v61 = vld [vmem:[%s2688_s14 + $0x100] sm:$0xff] }
  0x51   : > { %1081 = vmatpush.bf16.msrb.mxu3 %v2302_v9  ;;  %v468_v3 = vpack.c.bf16 %v377_v62, %v370_v61  ;;  %v384_v9 = vld [vmem:[%s2688_s14 + $0x170] sm:$0xff] }
  0x52   : > { %1130 = vmatpush.bf16.msrb.mxu0 %v2310_v19  ;;  %1179 = vmatpush.bf16.msrb.mxu1 %v2318_v20  ;;  %v475_v15 = vpack.c.bf16 %v391_v10, %v384_v9  ;;  %v397_v19 = vld [vmem:[%s2688_s14 + $0x1d8] sm:$0xff]  ;;  %v404_v20 = vld [vmem:[%s2688_s14 + $0x210] sm:$0xff]  ;;  %v427_v9 = vld [vmem:[%s2688_s14 + $0x2c8] sm:$0xff] }
  0x53   : > { %965 = vmatmul.bf16.gmra.mxu2 %v492_v11  ;;  %945 = vmatmul.bf16.gmra.mxu0 %v464_v13  ;;  %v385_v11 = vld [vmem:[%s2688_s14 + $0x178] sm:$0xff]  ;;  %v473_v13 = vpack.c.bf16 %v389_v6, %v382_v5  ;;  %v481_v26 = vpack.c.bf16 %v404_v20, %v397_v19  ;;  %v426_v5 = vld [vmem:[%s2688_s14 + $0x2c0] sm:$0xff] }
  0x54   : > { %1014 = vmatmul.bf16.gmra.mxu3 %v493_v12  ;;  %1228 = vmatpush.bf16.msra.mxu2 %v2326_v16  ;;  %v392_v12 = vld [vmem:[%s2688_s14 + $0x1b0] sm:$0xff]  ;;  %v433_v6 = vld [vmem:[%s2688_s14 + $0x2f8] sm:$0xff]  ;;  %v434_v10 = vld [vmem:[%s2688_s14 + $0x300] sm:$0xff] }
  0x55   : > { %994 = vmatmul.bf16.gmra.mxu1 %v465_v14  ;;  %v474_v14 = vpack.c.bf16 %v390_v8, %v383_v7  ;;  %v476_v16 = vpack.c.bf16 %v392_v12, %v385_v11 }
  0x63   : > { %970 = vmatmul.bf16.gmra.mxu2 %v499_v29  ;;  %950 = vmatmul.bf16.gmra.mxu0 %v471_v31 }
  0x64   : > { %1019 = vmatmul.bf16.gmra.mxu3 %v500_v30  ;;  %v483_v30 = vpack.c.bf16 %v406_v24, %v399_v23 }
  0x65   : > { %999 = vmatmul.bf16.gmra.mxu1 %v472_v32 }
  0x73   : > { %1033 = vmatmul.bf16.vlgmr.msrb.gmra.mxu2 %v452_v41  ;;  %1131 = vmatmul.bf16.vlgmr.msrb.gmra.mxu0 %v454_v43  ;;  %v417_v41 = vld [vmem:[%s2688_s14 + $0x278] sm:$0xff]  ;;  %v418_v43 = vld [vmem:[%s2688_s14 + $0x280] sm:$0xff] }
  0x74   : > { %1082 = vmatmul.bf16.vlgmr.msrb.gmra.mxu3 %v453_v42  ;;  %v411_v42 = vld [vmem:[%s2688_s14 + $0x248] sm:$0xff]  ;;  %v487_v51 = vpack.c.bf16 %v417_v41, %v410_v40  ;;  %v448_v40 = vld [vmem:[%s2688_s14 + $0x370] sm:$0xff] }
  0x75   : > { %1180 = vmatmul.bf16.vlgmr.msrb.gmra.mxu1 %v455_v44  ;;  %v412_v44 = vld [vmem:[%s2688_s14 + $0x250] sm:$0xff]  ;;  %v488_v52 = vpack.c.bf16 %v418_v43, %v411_v42 }
  0x83   : > { %1038 = vmatmul.bf16.gmra.mxu2 %v459_v53  ;;  %1136 = vmatmul.bf16.gmra.mxu0 %v461_v55  ;;  %v489_v53 = vpack.c.bf16 %v419_v45, %v412_v44  ;;  %v490_v55 = vpack.c.bf16 %v420_v49, %v413_v48 }
  0x84   : > { %1087 = vmatmul.bf16.gmra.mxu3 %v460_v54 }
  0x85   : > { %1185 = vmatmul.bf16.gmra.mxu1 %v462_v56 }
  0x93   : > { %1043 = vmatmul.bf16.gmra.mxu2 %v466_v1  ;;  %1141 = vmatmul.bf16.gmra.mxu0 %v468_v3  ;;  %v424_v1 = vld [vmem:[%s2688_s14 + $0x2b0] sm:$0xff]  ;;  %v425_v3 = vld [vmem:[%s2688_s14 + $0x2b8] sm:$0xff] }
  0x94   : > { %1092 = vmatmul.bf16.gmra.mxu3 %v467_v2  ;;  %v431_v2 = vld [vmem:[%s2688_s14 + $0x2e8] sm:$0xff] }
  0x95   : > { %1190 = vmatmul.bf16.gmra.mxu1 %v469_v4  ;;  %v432_v4 = vld [vmem:[%s2688_s14 + $0x2f0] sm:$0xff]  ;;  %v494_v12 = vpack.c.bf16 %v431_v2, %v424_v1 }
  0x96   : > { %v2333_v2 = vld [vmem:[%s3384_s3 + $0x30] sm:$0xff] }
  0xa3   : > { %1048 = vmatmul.bf16.gmra.mxu2 %v473_v13  ;;  %1146 = vmatmul.bf16.gmra.mxu0 %v475_v15  ;;  %v495_v13 = vpack.c.bf16 %v432_v4, %v425_v3 }
  0xa4   : > { %1097 = vmatmul.bf16.gmra.mxu3 %v474_v14  ;;  %v496_v14 = vpack.c.bf16 %v433_v6, %v426_v5  ;;  %v358_v5 = vld [vmem:[%s2688_s14 + $0xa0] sm:$0xff]  ;;  %v365_v6 = vld [vmem:[%s2688_s14 + $0xd8] sm:$0xff] }
  0xa5   : > { %1195 = vmatmul.bf16.gmra.mxu1 %v476_v16  ;;  %v497_v16 = vpack.c.bf16 %v434_v10, %v427_v9  ;;  %v463_v9 = vpack.c.bf16 %v365_v6, %v358_v5  ;;  %v2332_v10 = vld [vmem:[%s3384_s3 + $0x28] sm:$0xff]  ;;  %v2327_v5 = vld [vmem:[%s3384_s3] sm:$0xff] }
  0xb0   : > { %v936_v29 = vpop.f32.mrf.mxu0 }
  0xb1   : > { %v937_v31 = vadd.f32 %v2870_v27, %v936_v29  ;;  %v439_v29 = vld [vmem:[%s2688_s14 + $0x328] sm:$0xff] }
  0xb2   : > { %v985_v32 = vpop.f32.mrf.mxu1 }
  0xb3   : > { %1053 = vmatmul.bf16.gmra.mxu2 %v480_v25  ;;  %v2873_v33 = vadd.f32 %v985_v32, %v937_v31  ;;  %1151 = vmatmul.bf16.gmra.mxu0 %v482_v28  ;;  %v445_v28 = vld [vmem:[%s2688_s14 + $0x358] sm:$0xff]  ;;  %v440_v31 = vld [vmem:[%s2688_s14 + $0x330] sm:$0xff]  ;;  %v447_v32 = vld [vmem:[%s2688_s14 + $0x368] sm:$0xff] }
  0xb4   : > { %1102 = vmatmul.bf16.gmra.mxu3 %v481_v26  ;;  %v438_v26 = vld [vmem:[%s2688_s14 + $0x320] sm:$0xff]  ;;  %v503_v44 = vpack.c.bf16 %v447_v32, %v440_v31  ;;  %v407_v31 = vld [vmem:[%s2688_s14 + $0x228] sm:$0xff] }
  0xb5   : > { %1200 = vmatmul.bf16.gmra.mxu1 %v483_v30  ;;  %v446_v30 = vld [vmem:[%s2688_s14 + $0x360] sm:$0xff]  ;;  %v501_v42 = vpack.c.bf16 %v445_v28, %v438_v26  ;;  %v2330_v28 = vld [vmem:[%s3384_s3 + $0x18] sm:$0xff] }
  0xb6   : > { %v956_v34 = vpop.f32.mrf.mxu2  ;;  %v502_v43 = vpack.c.bf16 %v446_v30, %v439_v29 }
  0xb7   : > { %v1005_v35 = vpop.f32.mrf.mxu3  ;;  %v957_v36 = vadd.f32 %v2870_v27, %v956_v34 }
  0xb8   : > { %v2878_v38 = vpop.f32.mrf.mxu0 }
  0xb9   : > { %v2876_v37 = vadd.f32 %v1005_v35, %v957_v36  ;;  %v441_v36 = vld [vmem:[%s2688_s14 + $0x338] sm:$0xff] }
  0xba   : > { %v2880_v39 = vpop.f32.mrf.mxu1 }
  0xbe   : > { %v958_v46 = vpop.f32.mrf.mxu2 }
  0xbf   : > { %v2888_v47 = vpop.f32.mrf.mxu3  ;;  %v2893_v50 = vadd.f32 %v2870_v27, %v958_v46  ;;  %v504_v46 = vpack.c.bf16 %v448_v40, %v441_v36  ;;  %v2329_v36 = vld [vmem:[%s3384_s3 + $0x10] sm:$0xff] }
  0xc0   : > { %v941_v54 = vpop.f32.mrf.mxu0 }
  0xc1   : > { %v942_v56 = vadd.f32 %v2870_v27, %v941_v54 }
  0xc2   : > { %v990_v57 = vpop.f32.mrf.mxu1 }
  0xc3   : > { %1058 = vmatmul.bf16.gmra.mxu2 %v487_v51  ;;  %v2896_v58 = vadd.f32 %v990_v57, %v942_v56  ;;  %1156 = vmatmul.bf16.gmra.mxu0 %v489_v53  ;;  %v344_v57 = vld [vmem:[%s2688_s14 + $0x30] sm:$0xff] }
  0xc4   : > { %1107 = vmatmul.bf16.gmra.mxu3 %v488_v52  ;;  %v2334_v52 = vld [vmem:[%s3384_s3 + $0x38] sm:$0xff] }
  0xc5   : > { %1205 = vmatmul.bf16.gmra.mxu1 %v490_v55  ;;  %1362 = vmatpush.bf16.msra.mxu3 %v2334_v52 }
  0xc6   : > { %v961_v59 = vpop.f32.mrf.mxu2 }
  0xc7   : > { %v1010_v60 = vpop.f32.mrf.mxu3  ;;  %v962_v61 = vadd.f32 %v2870_v27, %v961_v59  ;;  %v351_v59 = vld [vmem:[%s2688_s14 + $0x68] sm:$0xff] }
  0xc8   : > { %v2901_v63 = vpop.f32.mrf.mxu0  ;;  %v456_v1 = vpack.c.bf16 %v351_v59, %v344_v57  ;;  %v435_v57 = vld [vmem:[%s2688_s14 + $0x308] sm:$0xff] }
  0xc9   : > { %v2899_v62 = vadd.f32 %v1010_v60, %v962_v61  ;;  %1363 = vmatpush.bf16.msra.mxu3 %v2333_v2 }
  0xca   : > { %v2903_v0 = vpop.f32.mrf.mxu1 }
  0xcd   : > { %1364 = vmatpush.bf16.msra.mxu3 %v2332_v10 }
  0xce   : > { %v963_v7 = vpop.f32.mrf.mxu2 }
  0xcf   : > { %v2911_v8 = vpop.f32.mrf.mxu3  ;;  %v2916_v11 = vadd.f32 %v2870_v27, %v963_v7 }
  0xd0   : > { %v946_v15 = vpop.f32.mrf.mxu0 }
  0xd1   : > { %v947_v17 = vadd.f32 %v2870_v27, %v946_v15  ;;  %v1013_v59 = vadd.f32 %v2911_v8, %v2916_v11  ;;  %v442_v8 = vld [vmem:[%s2688_s14 + $0x340] sm:$0xff]  ;;  %v449_v11 = vld [vmem:[%s2688_s14 + $0x378] sm:$0xff] }
  0xd2   : > { %v995_v18 = vpop.f32.mrf.mxu1 }
  0xd3   : > { %1063 = vmatmul.bf16.gmra.mxu2 %v494_v12  ;;  %v2919_v19 = vadd.f32 %v995_v18, %v947_v17  ;;  %1161 = vmatmul.bf16.gmra.mxu0 %v496_v14  ;;  %v379_v14 = vld [vmem:[%s2688_s14 + $0x148] sm:$0xff]  ;;  %v2331_v17 = vld [vmem:[%s3384_s3 + $0x20] sm:$0xff] }
  0xd4   : > { %1112 = vmatmul.bf16.gmra.mxu3 %v495_v13 }
  0xd5   : > { %1210 = vmatmul.bf16.gmra.mxu1 %v497_v16  ;;  %1365 = vmatpush.bf16.msra.mxu3 %v2331_v17 }
  0xd6   : > { %v966_v20 = vpop.f32.mrf.mxu2 }
  0xd7   : > { %v1015_v21 = vpop.f32.mrf.mxu3  ;;  %v967_v22 = vadd.f32 %v2870_v27, %v966_v20 }
  0xd8   : > { %v2924_v24 = vpop.f32.mrf.mxu0 }
  0xd9   : > { %v2922_v23 = vadd.f32 %v1015_v21, %v967_v22  ;;  %v393_v21 = vld [vmem:[%s2688_s14 + $0x1b8] sm:$0xff]  ;;  %1366 = vmatpush.bf16.msra.mxu3 %v2330_v28 }
  0xda   : > { %v2926_v25 = vpop.f32.mrf.mxu1 }
  0xdd   : > { %1367 = vmatpush.bf16.msra.mxu3 %v2329_v36 }
  0xde   : > { %v968_v34 = vpop.f32.mrf.mxu2 }
  0xdf   : > { %v2934_v35 = vpop.f32.mrf.mxu3  ;;  %v2939_v41 = vadd.f32 %v2870_v27, %v968_v34 }
  0xe0   : > { %v951_v45 = vpop.f32.mrf.mxu0 }
  0xe1   : > { %v952_v48 = vadd.f32 %v2870_v27, %v951_v45  ;;  %v1008_v45 = vadd.f32 %v2888_v47, %v2893_v50  ;;  %v428_v50 = vld [vmem:[%s2688_s14 + $0x2d0] sm:$0xff] }
  0xe2   : > { %v1000_v49 = vpop.f32.mrf.mxu1  ;;  %v498_v2 = vpack.c.bf16 %v435_v57, %v428_v50 }
  0xe3   : > { %1068 = vmatmul.bf16.gmra.mxu2 %v501_v42  ;;  %v1001_v51 = vadd.f32 %v1000_v49, %v952_v48  ;;  %1166 = vmatmul.bf16.gmra.mxu0 %v503_v44  ;;  %v421_v44 = vld [vmem:[%s2688_s14 + $0x298] sm:$0xff] }
  0xe4   : > { %1117 = vmatmul.bf16.gmra.mxu3 %v502_v43  ;;  %v414_v43 = vld [vmem:[%s2688_s14 + $0x260] sm:$0xff] }
  0xe5   : > { %1215 = vmatmul.bf16.gmra.mxu1 %v504_v46  ;;  %v491_v49 = vpack.c.bf16 %v421_v44, %v414_v43 }
  0xe6   : > { %v971_v53 = vpop.f32.mrf.mxu2 }
  0xe7   : > { %v1020_v54 = vpop.f32.mrf.mxu3  ;;  %v972_v55 = vadd.f32 %v2870_v27, %v971_v53 }
  0xe8   : > { %v3013_v52 = vpop.f32.mrf.mxu0 }
  0xe9   : > { %v2946_v56 = vadd.f32 %v1020_v54, %v972_v55 }
  0xea   : > { %v3018_v55 = vpop.f32.mrf.mxu1 }
  0xee   : > { %v973_v60 = vpop.f32.mrf.mxu2 }
  0xef   : > { %v2951_v61 = vadd.f32 %v2870_v27, %v973_v60 }
  0xf3   : > { %2169 = vmatmul.msk.bf16.vlgmr.msra.gmra.mxu2 %vm902_vm0, %v456_v1 }
  0xf6   : > { %v1034_v3 = vpop.f32.mrf.mxu2 }
  0xf7   : > { %v2958_v4 = vadd.f32 %v1034_v3, %v2873_v33  ;;  %v372_v33 = vld [vmem:[%s2688_s14 + $0x110] sm:$0xff]  ;;  %v1132_v3 = vpop.f32.mrf.mxu0 }
  0xf8   : > { %v470_v16 = vpack.c.bf16 %v379_v14, %v372_v33  ;;  %v1018_v33 = vadd.f32 %v2934_v35, %v2939_v41 }
  0xfe   : > { %v2962_v7 = vpop.f32.mrf.mxu2 }
 0x103   : > { %2170 = vmatmul.msk.bf16.gmra.mxu2 %vm902_vm0, %v463_v9 }
 0x106   : > { %v1039_v12 = vpop.f32.mrf.mxu2 }
 0x107   : > { %v2969_v13 = vadd.f32 %v1039_v12, %v2896_v58  ;;  %v386_v58 = vld [vmem:[%s2688_s14 + $0x180] sm:$0xff]  ;;  %v1134_v12 = vpop.f32.mrf.mxu0 }
 0x108   : > { %v477_v26 = vpack.c.bf16 %v393_v21, %v386_v58 }
 0x10e   : > { %v2973_v15 = vpop.f32.mrf.mxu2 }
 0x10f   : > { %v1137_v21 = vpop.f32.mrf.mxu0 }
 0x113   : > { %2171 = vmatmul.msk.bf16.gmra.mxu2 %vm902_vm0, %v470_v16 }
 0x116   : > { %v1044_v18 = vpop.f32.mrf.mxu2 }
 0x117   : > { %v2980_v20 = vadd.f32 %v1044_v18, %v2919_v19  ;;  %v400_v19 = vld [vmem:[%s2688_s14 + $0x1f0] sm:$0xff]  ;;  %v505_v18 = vpack.c.bf16 %v449_v11, %v442_v8  ;;  %s2494_s14 = scalar_lea.hbm %s2493_s29, 128 }
 0x118   : > { %v484_v34 = vpack.c.bf16 %v407_v31, %v400_v19  ;;  %v1139_v31 = vpop.f32.mrf.mxu0  ;;  %p2495_p11 = scmp.ne.s32.totalorder %s2493_s29, %s2494_s14  ;;  %p2500_p1 = scmp.lt.s32.totalorder %s2498_s23, %s2494_s14 }
 0x11a   : > { %p2496_p12 = pnand %p2495_p11, %p2632_p5  ;;  %p2501_p2 = por %p2500_p1, %p2499_p0 }
 0x11c   : > { %p2497_p13 = pneg %p2496_p12 }
 0x11e   : > { %v2984_v22 = vpop.f32.mrf.mxu2  ;;  %p2502_p3 = pnand %p2501_p2, %p2497_p13 }
 0x123   : > { %2172 = vmatmul.msk.bf16.gmra.mxu2 %vm902_vm0, %v477_v26 }
 0x126   : > { %v1049_v29 = vpop.f32.mrf.mxu2 }
 0x127   : > { %v2990_v30 = vadd.f32 %v1049_v29, %v1001_v51  ;;  %v1022_v51 = vpop.f32.mrf.mxu3  ;;  %v939_v29 = vadd.f32 %v2870_v27, %v2878_v38  ;;  %v944_v38 = vadd.f32 %v2870_v27, %v2901_v63 }
 0x128   : > { %v1023_v41 = vadd.f32 %v1022_v51, %v2951_v61  ;;  %v2342_v61 = vld [vmem:[%s3386_s5 + $0x38] sm:$0xff] }
 0x129   : > { %v988_v35 = vadd.f32 %v2880_v39, %v939_v29  ;;  %1503 = vmatpush.bf16.msra.mxu0 %v2342_v61 }
 0x12e   : > { %v2994_v32 = vpop.f32.mrf.mxu2 }
 0x12f   : > { %v1083_v47 = vpop.f32.mrf.mxu3 }
 0x130   : > { %v1084_v44 = vadd.f32 %v1083_v47, %v2958_v4 }
 0x133   : > { %2173 = vmatmul.msk.bf16.gmra.mxu2 %vm902_vm0, %v484_v34 }
 0x136   : > { %v1054_v40 = vpop.f32.mrf.mxu2 }
 0x137   : > { %v3001_v42 = vadd.f32 %v1054_v40, %v2876_v37  ;;  %v2328_v37 = vld [vmem:[%s3384_s3 + $0x8] sm:$0xff]  ;;  %v1085_v6 = vpop.f32.mrf.mxu3  ;;  %v1037_v40 = vadd.f32 %v2962_v7, %v988_v35  ;;  %v993_v7 = vadd.f32 %v2903_v0, %v944_v38  ;;  %v949_v0 = vadd.f32 %v2870_v27, %v2924_v24 }
 0x138   : > { %1368 = vmatpush.bf16.msra.mxu3 %v2328_v37  ;;  %v1142_v37 = vpop.f32.mrf.mxu0 }
 0x13c   : > { %1369 = vmatpush.bf16.msra.mxu3 %v2327_v5 }
 0x13e   : > { %v1056_v46 = vpop.f32.mrf.mxu2 }
 0x13f   : > { %v3007_v48 = vadd.f32 %v1056_v46, %v1008_v45  ;;  %v1088_v58 = vpop.f32.mrf.mxu3  ;;  %v1086_v45 = vadd.f32 %v1085_v6, %v1037_v40 }
 0x140   : > { %v1144_v63 = vpop.f32.mrf.mxu0  ;;  %v1089_v5 = vadd.f32 %v1088_v58, %v2969_v13  ;;  %v998_v13 = vadd.f32 %v2926_v25, %v949_v0  ;;  %v954_v25 = vadd.f32 %v2870_v27, %v3013_v52 }
 0x141   : > { %v1135_v39 = vadd.f32 %v1134_v12, %v1086_v45 }
 0x142   : > { %v1138_v8 = vadd.f32 %v1137_v21, %v1089_v5  ;;  %v1047_v21 = vadd.f32 %v2984_v22, %v998_v13 }
 0x143   : > { %2174 = vmatmul.msk.bf16.gmra.mxu2 %vm902_vm0, %v491_v49  ;;  %v1133_v49 = vadd.f32 %v1132_v3, %v1084_v44 }
 0x146   : > { %v1059_v53 = vpop.f32.mrf.mxu2 }
 0x147   : > { %v3016_v54 = vadd.f32 %v1059_v53, %v2899_v62  ;;  %v1181_v62 = vpop.f32.mrf.mxu1  ;;  %v1090_v19 = vpop.f32.mrf.mxu3 }
 0x148   : > { %v1182_v51 = vadd.f32 %v1181_v62, %v1133_v49 }
 0x14e   : > { %v1061_v60 = vpop.f32.mrf.mxu2 }
 0x14f   : > { %v3024_v1 = vadd.f32 %v1061_v60, %v1013_v59  ;;  %v1183_v14 = vpop.f32.mrf.mxu1  ;;  %v1042_v60 = vadd.f32 %v2973_v15, %v993_v7  ;;  %v2341_v15 = vld [vmem:[%s3386_s5 + $0x30] sm:$0xff] }
 0x150   : > { %v1184_v50 = vadd.f32 %v1183_v14, %v1135_v39  ;;  %1504 = vmatpush.bf16.msra.mxu0 %v2341_v15 }
 0x153   : > { %2175 = vmatmul.msk.bf16.gmra.mxu2 %vm902_vm0, %v498_v2 }
 0x156   : > { %v1064_v9 = vpop.f32.mrf.mxu2 }
 0x157   : > { %v3031_v10 = vadd.f32 %v1064_v9, %v2922_v23  ;;  %v1186_v28 = vpop.f32.mrf.mxu1  ;;  %v1091_v9 = vadd.f32 %v1090_v19, %v1042_v60 }
 0x158   : > { %v1187_v14 = vadd.f32 %v1186_v28, %v1138_v8 }
 0x15e   : > { %v1066_v16 = vpop.f32.mrf.mxu2 }
 0x15f   : > { %v3037_v17 = vadd.f32 %v1066_v16, %v1018_v33  ;;  %v1188_v43 = vpop.f32.mrf.mxu1  ;;  %v1140_v33 = vadd.f32 %v1139_v31, %v1091_v9  ;;  %v1147_v16 = vpop.f32.mrf.mxu0 }
 0x163   : > { %2176 = vmatmul.msk.bf16.gmra.mxu2 %vm902_vm0, %v505_v18  ;;  %v1189_v18 = vadd.f32 %v1188_v43, %v1140_v33 }
 0x166   : > { %v1069_v26 = vpop.f32.mrf.mxu2 }
 0x167   : > { %v3041_v23 = vadd.f32 %v1069_v26, %v2946_v56  ;;  %v1093_v56 = vpop.f32.mrf.mxu3  ;;  %v1191_v53 = vpop.f32.mrf.mxu1 }
 0x168   : > { %v1094_v31 = vadd.f32 %v1093_v56, %v2980_v20  ;;  %v1149_v28 = vpop.f32.mrf.mxu0  ;;  %v1003_v20 = vadd.f32 %v3018_v55, %v954_v25  ;;  %v2339_v55 = vld [vmem:[%s3386_s5 + $0x20] sm:$0xff] }
 0x16a   : > { %v1143_v45 = vadd.f32 %v1142_v37, %v1094_v31  ;;  %v1052_v37 = vadd.f32 %v2994_v32, %v1003_v20 }
 0x16c   : > { %v1192_v49 = vadd.f32 %v1191_v53, %v1143_v45 }
 0x16e   : > { %v1071_v34 = vpop.f32.mrf.mxu2 }
 0x16f   : > { %v3047_v36 = vadd.f32 %v1071_v34, %v1023_v41  ;;  %v1095_v47 = vpop.f32.mrf.mxu3  ;;  %v1193_v62 = vpop.f32.mrf.mxu1 }
 0x170   : > { %v1096_v40 = vadd.f32 %v1095_v47, %v1047_v21  ;;  %v1152_v7 = vpop.f32.mrf.mxu0 }
 0x172   : > { %v1145_v43 = vadd.f32 %v1144_v63, %v1096_v40 }
 0x174   : > { %v1194_v56 = vadd.f32 %v1193_v62, %v1145_v43 }
 0x176   : > { %v1230_v46 = vpop.f32.mrf.mxu2 }
 0x177   : > { %v1231_v4 = vadd.f32 %v1230_v46, %v1182_v51  ;;  %v1098_v11 = vpop.f32.mrf.mxu3  ;;  %v1196_v19 = vpop.f32.mrf.mxu1  ;;  %v2340_v46 = vld [vmem:[%s3386_s5 + $0x28] sm:$0xff] }
 0x178   : > { %1505 = vmatpush.bf16.msra.mxu0 %v2340_v46  ;;  %v1099_v52 = vadd.f32 %v1098_v11, %v2990_v30 }
 0x179   : > { %v1270_v2 = vmax.f32 %v1231_v4, 0.0 }
 0x17a   : > { %v1148_v60 = vadd.f32 %v1147_v16, %v1099_v52  ;;  %v2336_v52 = vld [vmem:[%s3386_s5 + $0x8] sm:$0xff] }
 0x17c   : > { %v1197_v63 = vadd.f32 %v1196_v19, %v1148_v60  ;;  %1506 = vmatpush.bf16.msra.mxu0 %v2339_v55 }
 0x17e   : > { %v1232_v57 = vpop.f32.mrf.mxu2 }
 0x17f   : > { %v1233_v59 = vadd.f32 %v1232_v57, %v1184_v50  ;;  %v1100_v24 = vpop.f32.mrf.mxu3  ;;  %v1198_v22 = vpop.f32.mrf.mxu1 }
 0x180   : > { %v1101_v57 = vadd.f32 %v1100_v24, %v1052_v37 }
 0x181   : > { %v1271_v3 = vmax.f32 %v1233_v59, 0.0 }
 0x183   : > { %v1286_v6 = vpack.c.bf16 %v1271_v3, %v1270_v2  ;;  %v1150_v2 = vadd.f32 %v1149_v28, %v1101_v57  ;;  %v1154_v3 = vpop.f32.mrf.mxu0 }
 0x185   : > { %1370 = vmatmul.bf16.vlgmr.msra.gmra.mxu3 %v1286_v6  ;;  %v1199_v32 = vadd.f32 %v1198_v22, %v1150_v2  ;;  %v2337_v22 = vld [vmem:[%s3386_s5 + $0x10] sm:$0xff] }
 0x186   : > { %v1235_v12 = vpop.f32.mrf.mxu2 }
 0x187   : > { %v1236_v58 = vadd.f32 %v1235_v12, %v1187_v14  ;;  %v1103_v38 = vpop.f32.mrf.mxu3  ;;  %v1201_v47 = vpop.f32.mrf.mxu1 }
 0x188   : > { %v1104_v11 = vadd.f32 %v1103_v38, %v3001_v42 }
 0x189   : > { %v1272_v35 = vmax.f32 %v1236_v58, 0.0  ;;  %v2338_v58 = vld [vmem:[%s3386_s5 + $0x18] sm:$0xff] }
 0x18a   : > { %v1153_v16 = vadd.f32 %v1152_v7, %v1104_v11  ;;  %1507 = vmatpush.bf16.msra.mxu0 %v2338_v58 }
 0x18b   : > { %v1157_v33 = vpop.f32.mrf.mxu0 }
 0x18e   : > { %v1237_v26 = vpop.f32.mrf.mxu2  ;;  %1508 = vmatpush.bf16.msra.mxu0 %v2337_v22  ;;  %v2348_v22 = vld [vmem:[%s3388_s7 + $0x28] sm:$0xff] }
 0x18f   : > { %v1238_v29 = vadd.f32 %v1237_v26, %v1189_v18  ;;  %v1105_v53 = vpop.f32.mrf.mxu3  ;;  %v1203_v6 = vpop.f32.mrf.mxu1 }
 0x190   : > { %v1106_v15 = vadd.f32 %v1105_v53, %v3007_v48  ;;  %v2335_v53 = vld [vmem:[%s3386_s5] sm:$0xff] }
 0x191   : > { %v1273_v41 = vmax.f32 %v1238_v29, 0.0  ;;  %v1202_v29 = vadd.f32 %v1201_v47, %v1153_v16 }
 0x192   : > { %v1155_v18 = vadd.f32 %v1154_v3, %v1106_v15  ;;  %1509 = vmatpush.bf16.msra.mxu0 %v2336_v52 }
 0x193   : > { %v1287_v34 = vpack.c.bf16 %v1273_v41, %v1272_v35  ;;  %v1159_v35 = vpop.f32.mrf.mxu0 }
 0x194   : > { %v1204_v19 = vadd.f32 %v1203_v6, %v1155_v18 }
 0x195   : > { %1375 = vmatmul.bf16.gmra.mxu3 %v1287_v34 }
 0x196   : > { %v1240_v44 = vpop.f32.mrf.mxu2  ;;  %1510 = vmatpush.bf16.msra.mxu0 %v2335_v53 }
 0x197   : > { %v1241_v39 = vadd.f32 %v1240_v44, %v1192_v49  ;;  %v1108_v62 = vpop.f32.mrf.mxu3  ;;  %v1206_v13 = vpop.f32.mrf.mxu1 }
 0x198   : > { %v1109_v34 = vadd.f32 %v1108_v62, %v3016_v54 }
 0x199   : > { %v1274_v50 = vmax.f32 %v1241_v39, 0.0 }
 0x19a   : > { %v1158_v25 = vadd.f32 %v1157_v33, %v1109_v34  ;;  %v2349_v34 = vld [vmem:[%s3388_s7 + $0x30] sm:$0xff] }
 0x19b   : > { %v1162_v43 = vpop.f32.mrf.mxu0 }
 0x19c   : > { %v1207_v49 = vadd.f32 %v1206_v13, %v1158_v25 }
 0x19e   : > { %v1242_v61 = vpop.f32.mrf.mxu2 }
 0x19f   : > { %v1243_v51 = vadd.f32 %v1242_v61, %v1194_v56  ;;  %v1110_v26 = vpop.f32.mrf.mxu3  ;;  %v1208_v48 = vpop.f32.mrf.mxu1 }
 0x1a0   : > { %v1111_v44 = vadd.f32 %v1110_v26, %v3024_v1 }
 0x1a1   : > { %v1275_v27 = vmax.f32 %v1243_v51, 0.0 }
 0x1a2   : > { %v1160_v46 = vadd.f32 %v1159_v35, %v1111_v44 }
 0x1a3   : > { %v1288_v4 = vpack.c.bf16 %v1275_v27, %v1274_v50  ;;  %v1164_v1 = vpop.f32.mrf.mxu0 }
 0x1a4   : > { %v1209_v20 = vadd.f32 %v1208_v48, %v1160_v46 }
 0x1a5   : > { %1380 = vmatmul.bf16.gmra.mxu3 %v1288_v4 }
 0x1a6   : > { %v1245_v59 = vpop.f32.mrf.mxu2 }
 0x1a7   : > { %v1246_v5 = vadd.f32 %v1245_v59, %v1197_v63  ;;  %v1113_v28 = vpop.f32.mrf.mxu3  ;;  %v1211_v38 = vpop.f32.mrf.mxu1 }
 0x1a8   : > { %v1114_v37 = vadd.f32 %v1113_v28, %v3031_v10 }
 0x1a9   : > { %v1276_v12 = vmax.f32 %v1246_v5, 0.0 }
 0x1aa   : > { %v1163_v57 = vadd.f32 %v1162_v43, %v1114_v37 }
 0x1ab   : > { %v1167_v10 = vpop.f32.mrf.mxu0 }
 0x1ac   : > { %v1212_v2 = vadd.f32 %v1211_v38, %v1163_v57 }
 0x1ae   : > { %v1247_v9 = vpop.f32.mrf.mxu2 }
 0x1af   : > { %v1248_v30 = vadd.f32 %v1247_v9, %v1199_v32  ;;  %v1115_v39 = vpop.f32.mrf.mxu3  ;;  %v1213_v4 = vpop.f32.mrf.mxu1 }
 0x1b0   : > { %v1116_v27 = vadd.f32 %v1115_v39, %v3037_v17 }
 0x1b1   : > { %v1277_v8 = vmax.f32 %v1248_v30, 0.0 }
 0x1b2   : > { %v1165_v60 = vadd.f32 %v1164_v1, %v1116_v27 }
 0x1b3   : > { %v1289_v0 = vpack.c.bf16 %v1277_v8, %v1276_v12  ;;  %v1169_v8 = vpop.f32.mrf.mxu0 }
 0x1b4   : > { %v1214_v55 = vadd.f32 %v1213_v4, %v1165_v60 }
 0x1b5   : > { %1385 = vmatmul.bf16.gmra.mxu3 %v1289_v0 }
 0x1b6   : > { %v1250_v14 = vpop.f32.mrf.mxu2 }
 0x1b7   : > { %v1251_v21 = vadd.f32 %v1250_v14, %v1202_v29  ;;  %v1118_v59 = vpop.f32.mrf.mxu3  ;;  %v1216_v32 = vpop.f32.mrf.mxu1 }
 0x1b8   : > { %v1119_v30 = vadd.f32 %v1118_v59, %v3041_v23  ;;  %v2350_v23 = vld [vmem:[%s3388_s7 + $0x38] sm:$0xff] }
 0x1b9   : > { %v1278_v24 = vmax.f32 %v1251_v21, 0.0  ;;  %1644 = vmatpush.bf16.msra.mxu1 %v2350_v23  ;;  %v3104_v21 = vld [vmem:[%s3385_s4] ss:$0 sm:$0xff] }
 0x1ba   : > { %v1168_v0 = vadd.f32 %v1167_v10, %v1119_v30 }
 0x1bc   : > { %v1217_v14 = vadd.f32 %v1216_v32, %v1168_v0 }
 0x1bd   : > { %1645 = vmatpush.bf16.msra.mxu1 %v2349_v34 }
 0x1be   : > { %v1252_v42 = vpop.f32.mrf.mxu2 }
 0x1bf   : > { %v1253_v41 = vadd.f32 %v1252_v42, %v1204_v19  ;;  %v1120_v9 = vpop.f32.mrf.mxu3  ;;  %v1218_v15 = vpop.f32.mrf.mxu1 }
 0x1c0   : > { %v1121_v12 = vadd.f32 %v1120_v9, %v3047_v36 }
 0x1c1   : > { %v1279_v31 = vmax.f32 %v1253_v41, 0.0  ;;  %1646 = vmatpush.bf16.msra.mxu1 %v2348_v22 }
 0x1c2   : > { %v1170_v33 = vadd.f32 %v1169_v8, %v1121_v12  ;;  %v2343_v12 = vld [vmem:[%s3388_s7] sm:$0xff] }
 0x1c3   : > { %v1290_v40 = vpack.c.bf16 %v1279_v31, %v1278_v24 }
 0x1c4   : > { %v1219_v16 = vadd.f32 %v1218_v15, %v1170_v33 }
 0x1c5   : > { %1390 = vmatmul.bf16.gmra.mxu3 %v1290_v40 }
 0x1c6   : > { %v1255_v45 = vpop.f32.mrf.mxu2 }
 0x1c7   : > { %v1256_v56 = vadd.f32 %v1255_v45, %v1207_v49 }
 0x1c9   : > { %v1280_v51 = vmax.f32 %v1256_v56, 0.0 }
 0x1ce   : > { %v1257_v54 = vpop.f32.mrf.mxu2 }
 0x1cf   : > { %v1258_v61 = vadd.f32 %v1257_v54, %v1209_v20 }
 0x1d1   : > { %v1281_v7 = vmax.f32 %v1258_v61, 0.0 }
 0x1d3   : > { %v1291_v50 = vpack.c.bf16 %v1281_v7, %v1280_v51  ;;  %v2347_v51 = vld [vmem:[%s3388_s7 + $0x20] sm:$0xff] }
 0x1d4   : > { %1647 = vmatpush.bf16.msra.mxu1 %v2347_v51 }
 0x1d5   : > { %1395 = vmatmul.bf16.gmra.mxu3 %v1291_v50 }
 0x1d6   : > { %v1260_v47 = vpop.f32.mrf.mxu2 }
 0x1d7   : > { %v1261_v17 = vadd.f32 %v1260_v47, %v1212_v2  ;;  %v2346_v47 = vld [vmem:[%s3388_s7 + $0x18] sm:$0xff] }
 0x1d8   : > { %1648 = vmatpush.bf16.msra.mxu1 %v2346_v47 }
 0x1d9   : > { %v1282_v5 = vmax.f32 %v1261_v17, 0.0  ;;  %v2345_v17 = vld [vmem:[%s3388_s7 + $0x10] sm:$0xff] }
 0x1dc   : > { %1649 = vmatpush.bf16.msra.mxu1 %v2345_v17 }
 0x1de   : > { %v1262_v3 = vpop.f32.mrf.mxu2 }
 0x1df   : > { %v1263_v63 = vadd.f32 %v1262_v3, %v1214_v55 }
 0x1e1   : > { %v1283_v6 = vmax.f32 %v1263_v63, 0.0 }
 0x1e3   : > { %v1292_v62 = vpack.c.bf16 %v1283_v6, %v1282_v5 }
 0x1e5   : > { %1400 = vmatmul.bf16.gmra.mxu3 %v1292_v62  ;;  %v2344_v62 = vld [vmem:[%s3388_s7 + $0x8] sm:$0xff] }
 0x1e6   : > { %v1265_v11 = vpop.f32.mrf.mxu2  ;;  %1650 = vmatpush.bf16.msra.mxu1 %v2344_v62 }
 0x1e7   : > { %v1266_v13 = vadd.f32 %v1265_v11, %v1217_v14 }
 0x1e9   : > { %v1284_v26 = vmax.f32 %v1266_v13, 0.0 }
 0x1ea   : > { %1651 = vmatpush.bf16.msra.mxu1 %v2343_v12 }
 0x1ee   : > { %v1267_v18 = vpop.f32.mrf.mxu2 }
 0x1ef   : > { %v1268_v58 = vadd.f32 %v1267_v18, %v1219_v16 }
 0x1f1   : > { %v1285_v29 = vmax.f32 %v1268_v58, 0.0 }
 0x1f3   : > { %v1293_v19 = vpack.c.bf16 %v1285_v29, %v1284_v26 }
 0x1f5   : > { %1405 = vmatmul.bf16.gmra.mxu3 %v1293_v19 }
 0x208   : > { %v1371_v36 = vpop.f32.mrf.mxu3 }
 0x209   : > { %v1372_v35 = vadd.f32 %v3104_v21, %v1371_v36 }
 0x20b   : > { %v1411_v24 = vmax.f32 %v1372_v35, 0.0  ;;  %v2412_v35 = vld [vmem:[%s3387_s6] ss:$0 sm:$0xff] }
 0x210   : > { %v1373_v42 = vpop.f32.mrf.mxu3 }
 0x211   : > { %v1374_v41 = vadd.f32 %v3104_v21, %v1373_v42 }
 0x213   : > { %v1412_v31 = vmax.f32 %v1374_v41, 0.0 }
 0x215   : > { %v1427_v48 = vpack.c.bf16 %v1412_v31, %v1411_v24 }
 0x217   : > { %1511 = vmatmul.bf16.vlgmr.msra.gmra.mxu0 %v1427_v48 }
 0x218   : > { %v1376_v40 = vpop.f32.mrf.mxu3 }
 0x219   : > { %v1377_v28 = vadd.f32 %v3104_v21, %v1376_v40 }
 0x21b   : > { %v1413_v25 = vmax.f32 %v1377_v28, 0.0 }
 0x220   : > { %v1378_v44 = vpop.f32.mrf.mxu3 }
 0x221   : > { %v1379_v45 = vadd.f32 %v3104_v21, %v1378_v44 }
 0x223   : > { %v1414_v43 = vmax.f32 %v1379_v45, 0.0 }
 0x225   : > { %v1428_v46 = vpack.c.bf16 %v1414_v43, %v1413_v25 }
 0x227   : > { %1516 = vmatmul.bf16.gmra.mxu0 %v1428_v46 }
 0x228   : > { %v1381_v49 = vpop.f32.mrf.mxu3 }
 0x229   : > { %v1382_v38 = vadd.f32 %v3104_v21, %v1381_v49 }
 0x22b   : > { %v1415_v39 = vmax.f32 %v1382_v38, 0.0 }
 0x230   : > { %v1383_v20 = vpop.f32.mrf.mxu3 }
 0x231   : > { %v1384_v56 = vadd.f32 %v3104_v21, %v1383_v20 }
 0x233   : > { %v1416_v54 = vmax.f32 %v1384_v56, 0.0 }
 0x235   : > { %v1429_v61 = vpack.c.bf16 %v1416_v54, %v1415_v39 }
 0x237   : > { %1521 = vmatmul.bf16.gmra.mxu0 %v1429_v61 }
 0x238   : > { %v1386_v7 = vpop.f32.mrf.mxu3 }
 0x239   : > { %v1387_v1 = vadd.f32 %v3104_v21, %v1386_v7 }
 0x23b   : > { %v1417_v27 = vmax.f32 %v1387_v1, 0.0 }
 0x240   : > { %v1388_v37 = vpop.f32.mrf.mxu3 }
 0x241   : > { %v1389_v50 = vadd.f32 %v3104_v21, %v1388_v37 }
 0x243   : > { %v1418_v52 = vmax.f32 %v1389_v50, 0.0 }
 0x245   : > { %v1430_v4 = vpack.c.bf16 %v1418_v52, %v1417_v27 }
 0x247   : > { %1526 = vmatmul.bf16.gmra.mxu0 %v1430_v4 }
 0x248   : > { %v1391_v57 = vpop.f32.mrf.mxu3 }
 0x249   : > { %v1392_v53 = vadd.f32 %v3104_v21, %v1391_v57 }
 0x24b   : > { %v1419_v2 = vmax.f32 %v1392_v53, 0.0 }
 0x250   : > { %v1393_v59 = vpop.f32.mrf.mxu3 }
 0x251   : > { %v1394_v60 = vadd.f32 %v3104_v21, %v1393_v59 }
 0x253   : > { %v1420_v10 = vmax.f32 %v1394_v60, 0.0 }
 0x255   : > { %v1431_v55 = vpack.c.bf16 %v1420_v10, %v1419_v2 }
 0x257   : > { %1531 = vmatmul.bf16.gmra.mxu0 %v1431_v55 }
 0x258   : > { %v1396_v3 = vpop.f32.mrf.mxu3 }
 0x259   : > { %v1397_v63 = vadd.f32 %v3104_v21, %v1396_v3 }
 0x25b   : > { %v1421_v6 = vmax.f32 %v1397_v63, 0.0 }
 0x260   : > { %v1398_v32 = vpop.f32.mrf.mxu3 }
 0x261   : > { %v1399_v5 = vadd.f32 %v3104_v21, %v1398_v32 }
 0x263   : > { %v1422_v9 = vmax.f32 %v1399_v5, 0.0 }
 0x265   : > { %v1432_v30 = vpack.c.bf16 %v1422_v9, %v1421_v6 }
 0x267   : > { %1536 = vmatmul.bf16.gmra.mxu0 %v1432_v30 }
 0x268   : > { %v1401_v8 = vpop.f32.mrf.mxu3 }
 0x269   : > { %v1402_v11 = vadd.f32 %v3104_v21, %v1401_v8 }
 0x26b   : > { %v1423_v15 = vmax.f32 %v1402_v11, 0.0 }
 0x270   : > { %v1403_v0 = vpop.f32.mrf.mxu3 }
 0x271   : > { %v1404_v33 = vadd.f32 %v3104_v21, %v1403_v0 }
 0x273   : > { %v1424_v14 = vmax.f32 %v1404_v33, 0.0 }
 0x275   : > { %v1433_v16 = vpack.c.bf16 %v1424_v14, %v1423_v15 }
 0x277   : > { %1541 = vmatmul.bf16.gmra.mxu0 %v1433_v16 }
 0x278   : > { %v1406_v13 = vpop.f32.mrf.mxu3 }
 0x279   : > { %v1407_v18 = vadd.f32 %v3104_v21, %v1406_v13  ;;  %v1693_v13 = vlaneseq }
 0x27b   : > { %v1425_v29 = vmax.f32 %v1407_v18, 0.0  ;;  %v3146_v18 = vand.u32 127, %v1693_v13 }
 0x27d   : > { %vm1695_vm1 = vcmp.lt.s32.totalorder %v3146_v18, 10 }
 0x280   : > { %v1408_v58 = vpop.f32.mrf.mxu3 }
 0x281   : > { %v1409_v26 = vadd.f32 %v3104_v21, %v1408_v58  ;;  %v3151_v58 = vld [vmem:[%s3389_s8] ss:$0 sm:$0xff] }
 0x283   : > { %v1426_v19 = vmax.f32 %v1409_v26, 0.0 }
 0x285   : > { %v1434_v23 = vpack.c.bf16 %v1426_v19, %v1425_v29 }
 0x287   : > { %1546 = vmatmul.bf16.gmra.mxu0 %v1434_v23 }
 0x294   : > { %v1512_v36 = vpop.f32.mrf.mxu0 }
 0x295   : > { %v1513_v42 = vadd.f32 %v2412_v35, %v1512_v36 }
 0x297   : > { %v1552_v31 = vmax.f32 %v1513_v42, 0.0 }
 0x29c   : > { %v1514_v41 = vpop.f32.mrf.mxu0 }
 0x29d   : > { %v1515_v24 = vadd.f32 %v2412_v35, %v1514_v41 }
 0x29f   : > { %v1553_v48 = vmax.f32 %v1515_v24, 0.0 }
 0x2a1   : > { %v1568_v34 = vpack.c.bf16 %v1553_v48, %v1552_v31 }
 0x2a3   : > { %1652 = vmatmul.bf16.vlgmr.msra.gmra.mxu1 %v1568_v34 }
 0x2a4   : > { %v1517_v40 = vpop.f32.mrf.mxu0 }
 0x2a5   : > { %v1518_v28 = vadd.f32 %v2412_v35, %v1517_v40 }
 0x2a7   : > { %v1554_v45 = vmax.f32 %v1518_v28, 0.0 }
 0x2ac   : > { %v1519_v44 = vpop.f32.mrf.mxu0 }
 0x2ad   : > { %v1520_v21 = vadd.f32 %v2412_v35, %v1519_v44 }
 0x2af   : > { %v1555_v25 = vmax.f32 %v1520_v21, 0.0 }
 0x2b1   : > { %v1569_v43 = vpack.c.bf16 %v1555_v25, %v1554_v45 }
 0x2b3   : > { %1657 = vmatmul.bf16.gmra.mxu1 %v1569_v43 }
 0x2b4   : > { %v1522_v46 = vpop.f32.mrf.mxu0 }
 0x2b5   : > { %v1523_v22 = vadd.f32 %v2412_v35, %v1522_v46 }
 0x2b7   : > { %v1556_v20 = vmax.f32 %v1523_v22, 0.0 }
 0x2bc   : > { %v1524_v49 = vpop.f32.mrf.mxu0 }
 0x2bd   : > { %v1525_v38 = vadd.f32 %v2412_v35, %v1524_v49 }
 0x2bf   : > { %v1557_v56 = vmax.f32 %v1525_v38, 0.0 }
 0x2c1   : > { %v1570_v39 = vpack.c.bf16 %v1557_v56, %v1556_v20 }
 0x2c3   : > { %1662 = vmatmul.bf16.gmra.mxu1 %v1570_v39 }
 0x2c4   : > { %v1527_v54 = vpop.f32.mrf.mxu0 }
 0x2c5   : > { %v1528_v61 = vadd.f32 %v2412_v35, %v1527_v54 }
 0x2c7   : > { %v1558_v1 = vmax.f32 %v1528_v61, 0.0 }
 0x2cc   : > { %v1529_v51 = vpop.f32.mrf.mxu0 }
 0x2cd   : > { %v1530_v7 = vadd.f32 %v2412_v35, %v1529_v51 }
 0x2cf   : > { %v1559_v37 = vmax.f32 %v1530_v7, 0.0 }
 0x2d1   : > { %v1571_v50 = vpack.c.bf16 %v1559_v37, %v1558_v1 }
 0x2d3   : > { %1667 = vmatmul.bf16.gmra.mxu1 %v1571_v50 }
 0x2d4   : > { %v1532_v27 = vpop.f32.mrf.mxu0 }
 0x2d5   : > { %v1533_v52 = vadd.f32 %v2412_v35, %v1532_v27 }
 0x2d7   : > { %v1560_v57 = vmax.f32 %v1533_v52, 0.0 }
 0x2dc   : > { %v1534_v4 = vpop.f32.mrf.mxu0 }
 0x2dd   : > { %v1535_v47 = vadd.f32 %v2412_v35, %v1534_v4 }
 0x2df   : > { %v1561_v53 = vmax.f32 %v1535_v47, 0.0 }
 0x2e1   : > { %v1572_v59 = vpack.c.bf16 %v1561_v53, %v1560_v57 }
 0x2e3   : > { %1672 = vmatmul.bf16.gmra.mxu1 %v1572_v59 }
 0x2e4   : > { %v1537_v60 = vpop.f32.mrf.mxu0 }
 0x2e5   : > { %v1538_v2 = vadd.f32 %v2412_v35, %v1537_v60 }
 0x2e7   : > { %v1562_v17 = vmax.f32 %v1538_v2, 0.0 }
 0x2ec   : > { %v1539_v10 = vpop.f32.mrf.mxu0 }
 0x2ed   : > { %v1540_v55 = vadd.f32 %v2412_v35, %v1539_v10 }
 0x2ef   : > { %v1563_v3 = vmax.f32 %v1540_v55, 0.0 }
 0x2f1   : > { %v1573_v63 = vpack.c.bf16 %v1563_v3, %v1562_v17 }
 0x2f3   : > { %1677 = vmatmul.bf16.gmra.mxu1 %v1573_v63 }
 0x2f4   : > { %v1542_v32 = vpop.f32.mrf.mxu0 }
 0x2f5   : > { %v1543_v5 = vadd.f32 %v2412_v35, %v1542_v32 }
 0x2f7   : > { %v1564_v30 = vmax.f32 %v1543_v5, 0.0 }
 0x2fc   : > { %v1544_v6 = vpop.f32.mrf.mxu0 }
 0x2fd   : > { %v1545_v9 = vadd.f32 %v2412_v35, %v1544_v6 }
 0x2ff   : > { %v1565_v62 = vmax.f32 %v1545_v9, 0.0 }
 0x301   : > { %v1574_v12 = vpack.c.bf16 %v1565_v62, %v1564_v30 }
 0x303   : > { %1682 = vmatmul.bf16.gmra.mxu1 %v1574_v12 }
 0x304   : > { %v1547_v8 = vpop.f32.mrf.mxu0 }
 0x305   : > { %v1548_v11 = vadd.f32 %v2412_v35, %v1547_v8 }
 0x307   : > { %v1566_v15 = vmax.f32 %v1548_v11, 0.0 }
 0x30c   : > { %v1549_v0 = vpop.f32.mrf.mxu0 }
 0x30d   : > { %v1550_v33 = vadd.f32 %v2412_v35, %v1549_v0 }
 0x30f   : > { %v1567_v14 = vmax.f32 %v1550_v33, 0.0 }
 0x311   : > { %v1575_v16 = vpack.c.bf16 %v1567_v14, %v1566_v15 }
 0x313   : > { %1687 = vmatmul.bf16.gmra.mxu1 %v1575_v16 }
 0x320   : > { %v1653_v26 = vpop.f32.mrf.mxu1 }
 0x321   : > { %v1654_v29 = vadd.f32 %v3151_v58, %v1653_v26 }
 0x323   : > { %v1696_v19 = vsel %vm1695_vm1, %v1654_v29, -1e+30 }
 0x324   : > { %1712 = vmax.xlane.f32.xlu0 %v1696_v19 }
 0x328   : > { %v1655_v23 = vpop.f32.mrf.mxu1 }
 0x329   : > { %v1656_v36 = vadd.f32 %v3151_v58, %v1655_v23 }
 0x32b   : > { %v3160_v35 = vsel %vm1695_vm1, %v1656_v36, -1e+30 }
 0x32c   : > { %1714 = vmax.xlane.f32.xlu0 %v3160_v35 }
 0x330   : > { %v1658_v42 = vpop.f32.mrf.mxu1 }
 0x331   : > { %v1659_v41 = vadd.f32 %v3151_v58, %v1658_v42 }
 0x333   : > { %v3166_v24 = vsel %vm1695_vm1, %v1659_v41, -1e+30 }
 0x334   : > { %1716 = vmax.xlane.f32.xlu1 %v3166_v24 }
 0x338   : > { %v1660_v31 = vpop.f32.mrf.mxu1 }
 0x339   : > { %v1661_v48 = vadd.f32 %v3151_v58, %v1660_v31 }
 0x33b   : > { %v3172_v34 = vsel %vm1695_vm1, %v1661_v48, -1e+30 }
 0x33c   : > { %1718 = vmax.xlane.f32.xlu1 %v3172_v34 }
 0x340   : > { %v1663_v40 = vpop.f32.mrf.mxu1 }
 0x341   : > { %v1664_v28 = vadd.f32 %v3151_v58, %v1663_v40 }
 0x343   : > { %v3178_v44 = vsel %vm1695_vm1, %v1664_v28, -1e+30 }
 0x344   : > { %1720 = vmax.xlane.f32.xlu2 %v3178_v44 }
 0x348   : > { %v1665_v21 = vpop.f32.mrf.mxu1 }
 0x349   : > { %v1666_v45 = vadd.f32 %v3151_v58, %v1665_v21 }
 0x34b   : > { %v3184_v25 = vsel %vm1695_vm1, %v1666_v45, -1e+30 }
 0x34c   : > { %1722 = vmax.xlane.f32.xlu2 %v3184_v25 }
 0x350   : > { %v1668_v43 = vpop.f32.mrf.mxu1 }
 0x351   : > { %v1669_v46 = vadd.f32 %v3151_v58, %v1668_v43 }
 0x353   : > { %v3190_v22 = vsel %vm1695_vm1, %v1669_v46, -1e+30 }
 0x354   : > { %1724 = vmax.xlane.f32.xlu0 %v3190_v22 }
 0x358   : > { %v1670_v49 = vpop.f32.mrf.mxu1 }
 0x359   : > { %v1671_v38 = vadd.f32 %v3151_v58, %v1670_v49 }
 0x35b   : > { %v3196_v20 = vsel %vm1695_vm1, %v1671_v38, -1e+30 }
 0x35c   : > { %1726 = vmax.xlane.f32.xlu1 %v3196_v20 }
 0x360   : > { %v1673_v56 = vpop.f32.mrf.mxu1 }
 0x361   : > { %v1674_v39 = vadd.f32 %v3151_v58, %v1673_v56 }
 0x363   : > { %v3202_v54 = vsel %vm1695_vm1, %v1674_v39, -1e+30 }
 0x364   : > { %1728 = vmax.xlane.f32.xlu2 %v3202_v54 }
 0x368   : > { %v1675_v61 = vpop.f32.mrf.mxu1 }
 0x369   : > { %v1676_v51 = vadd.f32 %v3151_v58, %v1675_v61 }
 0x36b   : > { %v3208_v7 = vsel %vm1695_vm1, %v1676_v51, -1e+30 }
 0x36c   : > { %1730 = vmax.xlane.f32.xlu0 %v3208_v7 }
 0x370   : > { %v1678_v1 = vpop.f32.mrf.mxu1 }
 0x371   : > { %v1679_v37 = vadd.f32 %v3151_v58, %v1678_v1 }
 0x373   : > { %v3214_v50 = vsel %vm1695_vm1, %v1679_v37, -1e+30 }
 0x374   : > { %1732 = vmax.xlane.f32.xlu1 %v3214_v50 }
 0x378   : > { %v1680_v27 = vpop.f32.mrf.mxu1 }
 0x379   : > { %v1681_v52 = vadd.f32 %v3151_v58, %v1680_v27 }
 0x37b   : > { %v3220_v4 = vsel %vm1695_vm1, %v1681_v52, -1e+30 }
 0x37c   : > { %1734 = vmax.xlane.f32.xlu2 %v3220_v4 }
 0x380   : > { %v1683_v47 = vpop.f32.mrf.mxu1 }
 0x381   : > { %v1684_v57 = vadd.f32 %v3151_v58, %v1683_v47 }
 0x383   : > { %v3226_v53 = vsel %vm1695_vm1, %v1684_v57, -1e+30 }
 0x384   : > { %1736 = vmax.xlane.f32.xlu0 %v3226_v53 }
 0x388   : > { %v1685_v59 = vpop.f32.mrf.mxu1 }
 0x389   : > { %v1686_v60 = vadd.f32 %v3151_v58, %v1685_v59 }
 0x38b   : > { %v3232_v2 = vsel %vm1695_vm1, %v1686_v60, -1e+30 }
 0x38c   : > { %1738 = vmax.xlane.f32.xlu1 %v3232_v2 }
 0x390   : > { %v1688_v10 = vpop.f32.mrf.mxu1 }
 0x391   : > { %v1689_v55 = vadd.f32 %v3151_v58, %v1688_v10 }
 0x393   : > { %v3238_v17 = vsel %vm1695_vm1, %v1689_v55, -1e+30 }
 0x394   : > { %1740 = vmax.xlane.f32.xlu2 %v3238_v17 }
 0x397   : > { %v1713_v3 = vpop.xlane.xlu0 %1712 }
 0x398   : > { %v3241_v63 = vsub.f32 %v1696_v19, %v1713_v3  ;;  %v1690_v32 = vpop.f32.mrf.mxu1 }
 0x399   : > { %v1691_v5 = vadd.f32 %v3151_v58, %v1690_v32 }
 0x39a   : > { %v1760_v6 = vmul.f32 1.442695, %v3241_v63 }
 0x39b   : > { %v3247_v9 = vsel %vm1695_vm1, %v1691_v5, -1e+30 }
 0x39c   : > { %2414 = vpow2.f32 %v1760_v6  ;;  %1742 = vmax.xlane.f32.xlu0 %v3247_v9 }
 0x39f   : > { %v1715_v30 = vpop.xlane.xlu0 %1714 }
 0x3a0   : > { %v3251_v62 = vsub.f32 %v3160_v35, %v1715_v30 }
 0x3a2   : > { %v2415_v12 = vpop.eup %2414  ;;  %v1762_v8 = vmul.f32 1.442695, %v3251_v62 }
 0x3a3   : > { %1792 = vadd.xlane.f32.xlu1 %v2415_v12 }
 0x3a4   : > { %2416 = vpow2.f32 %v1762_v8 }
 0x3a7   : > { %v1717_v11 = vpop.xlane.xlu1 %1716 }
 0x3a8   : > { %v3255_v0 = vsub.f32 %v3166_v24, %v1717_v11 }
 0x3aa   : > { %v2417_v33 = vpop.eup %2416  ;;  %v1764_v15 = vmul.f32 1.442695, %v3255_v0 }
 0x3ab   : > { %1794 = vadd.xlane.f32.xlu2 %v2417_v33 }
 0x3ac   : > { %2418 = vpow2.f32 %v1764_v15 }
 0x3af   : > { %v1719_v14 = vpop.xlane.xlu1 %1718 }
 0x3b0   : > { %v3259_v16 = vsub.f32 %v3172_v34, %v1719_v14 }
 0x3b2   : > { %v2419_v13 = vpop.eup %2418  ;;  %v1766_v18 = vmul.f32 1.442695, %v3259_v16 }
 0x3b3   : > { %1796 = vadd.xlane.f32.xlu0 %v2419_v13 }
 0x3b4   : > { %2420 = vpow2.f32 %v1766_v18 }
 0x3b7   : > { %v1721_v58 = vpop.xlane.xlu2 %1720 }
 0x3b8   : > { %v3263_v26 = vsub.f32 %v3178_v44, %v1721_v58 }
 0x3ba   : > { %v2421_v29 = vpop.eup %2420  ;;  %v1768_v19 = vmul.f32 1.442695, %v3263_v26 }
 0x3bb   : > { %1798 = vadd.xlane.f32.xlu1 %v2421_v29 }
 0x3bc   : > { %2422 = vpow2.f32 %v1768_v19 }
 0x3bf   : > { %v1723_v23 = vpop.xlane.xlu2 %1722 }
 0x3c0   : > { %v3267_v36 = vsub.f32 %v3184_v25, %v1723_v23 }
 0x3c2   : > { %v2423_v35 = vpop.eup %2422  ;;  %v1770_v42 = vmul.f32 1.442695, %v3267_v36 }
 0x3c3   : > { %1800 = vadd.xlane.f32.xlu2 %v2423_v35 }
 0x3c4   : > { %2424 = vpow2.f32 %v1770_v42 }
 0x3c7   : > { %v1725_v41 = vpop.xlane.xlu0 %1724 }
 0x3c8   : > { %v3271_v24 = vsub.f32 %v3190_v22, %v1725_v41 }
 0x3ca   : > { %v2425_v31 = vpop.eup %2424  ;;  %v1772_v48 = vmul.f32 1.442695, %v3271_v24 }
 0x3cb   : > { %1802 = vadd.xlane.f32.xlu0 %v2425_v31 }
 0x3cc   : > { %2426 = vpow2.f32 %v1772_v48 }
 0x3cf   : > { %v1727_v34 = vpop.xlane.xlu1 %1726 }
 0x3d0   : > { %v3275_v40 = vsub.f32 %v3196_v20, %v1727_v34 }
 0x3d2   : > { %v2427_v28 = vpop.eup %2426  ;;  %v1774_v44 = vmul.f32 1.442695, %v3275_v40 }
 0x3d3   : > { %1804 = vadd.xlane.f32.xlu1 %v2427_v28 }
 0x3d4   : > { %2428 = vpow2.f32 %v1774_v44 }
 0x3d7   : > { %v1729_v21 = vpop.xlane.xlu2 %1728 }
 0x3d8   : > { %v3279_v45 = vsub.f32 %v3202_v54, %v1729_v21 }
 0x3da   : > { %v2429_v25 = vpop.eup %2428  ;;  %v1776_v43 = vmul.f32 1.442695, %v3279_v45 }
 0x3db   : > { %1806 = vadd.xlane.f32.xlu2 %v2429_v25 }
 0x3dc   : > { %2430 = vpow2.f32 %v1776_v43 }
 0x3df   : > { %v1731_v46 = vpop.xlane.xlu0 %1730 }
 0x3e0   : > { %v3283_v22 = vsub.f32 %v3208_v7, %v1731_v46 }
 0x3e2   : > { %v2431_v49 = vpop.eup %2430  ;;  %v1778_v38 = vmul.f32 1.442695, %v3283_v22 }
 0x3e3   : > { %1808 = vadd.xlane.f32.xlu0 %v2431_v49 }
 0x3e4   : > { %2432 = vpow2.f32 %v1778_v38 }
 0x3e7   : > { %v1733_v20 = vpop.xlane.xlu1 %1732 }
 0x3e8   : > { %v3287_v56 = vsub.f32 %v3214_v50, %v1733_v20 }
 0x3ea   : > { %v2433_v39 = vpop.eup %2432  ;;  %v1780_v54 = vmul.f32 1.442695, %v3287_v56 }
 0x3eb   : > { %1810 = vadd.xlane.f32.xlu1 %v2433_v39 }
 0x3ec   : > { %2434 = vpow2.f32 %v1780_v54 }
 0x3ef   : > { %v1735_v61 = vpop.xlane.xlu2 %1734 }
 0x3f0   : > { %v3291_v51 = vsub.f32 %v3220_v4, %v1735_v61 }
 0x3f2   : > { %v2435_v7 = vpop.eup %2434  ;;  %v1782_v1 = vmul.f32 1.442695, %v3291_v51 }
 0x3f3   : > { %1812 = vadd.xlane.f32.xlu2 %v2435_v7 }
 0x3f4   : > { %2436 = vpow2.f32 %v1782_v1 }
 0x3f7   : > { %v1737_v37 = vpop.xlane.xlu0 %1736 }
 0x3f8   : > { %v3295_v27 = vsub.f32 %v3226_v53, %v1737_v37 }
 0x3fa   : > { %v2437_v50 = vpop.eup %2436  ;;  %v1784_v52 = vmul.f32 1.442695, %v3295_v27 }
 0x3fb   : > { %1814 = vadd.xlane.f32.xlu0 %v2437_v50 }
 0x3fc   : > { %2438 = vpow2.f32 %v1784_v52 }
 0x3ff   : > { %v1739_v47 = vpop.xlane.xlu1 %1738 }
 0x400   : > { %v3299_v57 = vsub.f32 %v3232_v2, %v1739_v47 }
 0x402   : > { %v2439_v4 = vpop.eup %2438  ;;  %v1786_v59 = vmul.f32 1.442695, %v3299_v57 }
 0x403   : > { %1816 = vadd.xlane.f32.xlu1 %v2439_v4 }
 0x404   : > { %2440 = vpow2.f32 %v1786_v59 }
 0x407   : > { %v1741_v60 = vpop.xlane.xlu2 %1740 }
 0x408   : > { %v3303_v10 = vsub.f32 %v3238_v17, %v1741_v60 }
 0x40a   : > { %v2441_v53 = vpop.eup %2440  ;;  %v1788_v55 = vmul.f32 1.442695, %v3303_v10 }
 0x40b   : > { %1818 = vadd.xlane.f32.xlu2 %v2441_v53 }
 0x40c   : > { %2442 = vpow2.f32 %v1788_v55 }
 0x40f   : > { %v1743_v3 = vpop.xlane.xlu0 %1742 }
 0x410   : > { %v3307_v2 = vsub.f32 %v3247_v9, %v1743_v3 }
 0x412   : > { %v2443_v32 = vpop.eup %2442  ;;  %v1790_v5 = vmul.f32 1.442695, %v3307_v2 }
 0x413   : > { %1820 = vadd.xlane.f32.xlu0 %v2443_v32 }
 0x414   : > { %2444 = vpow2.f32 %v1790_v5 }
 0x416   : > { %v1793_v6 = vpop.xlane.xlu1 %1792 }
 0x417   : > { %2446 = vlog2.f32 %v1793_v6 }
 0x41a   : > { %v2445_v17 = vpop.eup %2444 }
 0x41b   : > { %1822 = vadd.xlane.f32.xlu1 %v2445_v17 }
 0x41d   : > { %v2447_v30 = vpop.eup %2446 }
 0x41e   : > { %v1825_v12 = vmul.f32 0.6931472, %v2447_v30  ;;  %v1795_v8 = vpop.xlane.xlu2 %1794 }
 0x41f   : > { %2448 = vlog2.f32 %v1795_v8 }
 0x420   : > { %v1856_v11 = vsub.f32 %v3241_v63, %v1825_v12 }
 0x422   : > { %1872 = vst [vmem:[%s3314_s22] sm:$0xff] %v1856_v11 }
 0x425   : > { %v2449_v9 = vpop.eup %2448 }
 0x426   : > { %v1827_v33 = vmul.f32 0.6931472, %v2449_v9  ;;  %v1797_v15 = vpop.xlane.xlu0 %1796 }
 0x427   : > { %2450 = vlog2.f32 %v1797_v15 }
 0x428   : > { %v1857_v14 = vsub.f32 %v3251_v62, %v1827_v33 }
 0x42a   : > { %1873 = vst [vmem:[%s3314_s22 + $0x8] sm:$0xff] %v1857_v14 }
 0x42d   : > { %v2451_v13 = vpop.eup %2450 }
 0x42e   : > { %v1829_v18 = vmul.f32 0.6931472, %v2451_v13  ;;  %v1799_v58 = vpop.xlane.xlu1 %1798 }
 0x42f   : > { %2452 = vlog2.f32 %v1799_v58 }
 0x430   : > { %v1858_v63 = vsub.f32 %v3255_v0, %v1829_v18 }
 0x432   : > { %1874 = vst [vmem:[%s3314_s22 + $0x10] sm:$0xff] %v1858_v63 }
 0x435   : > { %v2453_v29 = vpop.eup %2452 }
 0x436   : > { %v1831_v19 = vmul.f32 0.6931472, %v2453_v29  ;;  %v1801_v23 = vpop.xlane.xlu2 %1800 }
 0x437   : > { %2454 = vlog2.f32 %v1801_v23 }
 0x438   : > { %v1859_v35 = vsub.f32 %v3259_v16, %v1831_v19 }
 0x43a   : > { %1875 = vst [vmem:[%s3314_s22 + $0x18] sm:$0xff] %v1859_v35 }
 0x43d   : > { %v2455_v42 = vpop.eup %2454 }
 0x43e   : > { %v1833_v41 = vmul.f32 0.6931472, %v2455_v42  ;;  %v1803_v62 = vpop.xlane.xlu0 %1802 }
 0x43f   : > { %2456 = vlog2.f32 %v1803_v62 }
 0x440   : > { %v1860_v31 = vsub.f32 %v3263_v26, %v1833_v41 }
 0x442   : > { %1876 = vst [vmem:[%s3314_s22 + $0x20] sm:$0xff] %v1860_v31 }
 0x445   : > { %v2457_v48 = vpop.eup %2456 }
 0x446   : > { %v1835_v34 = vmul.f32 0.6931472, %v2457_v48  ;;  %v1805_v0 = vpop.xlane.xlu1 %1804 }
 0x447   : > { %2458 = vlog2.f32 %v1805_v0 }
 0x448   : > { %v1861_v28 = vsub.f32 %v3267_v36, %v1835_v34 }
 0x44a   : > { %1877 = vst [vmem:[%s3314_s22 + $0x28] sm:$0xff] %v1861_v28 }
 0x44d   : > { %v2459_v44 = vpop.eup %2458 }
 0x44e   : > { %v1837_v21 = vmul.f32 0.6931472, %v2459_v44  ;;  %v1807_v16 = vpop.xlane.xlu2 %1806 }
 0x44f   : > { %2460 = vlog2.f32 %v1807_v16 }
 0x450   : > { %v1862_v25 = vsub.f32 %v3271_v24, %v1837_v21 }
 0x452   : > { %1878 = vst [vmem:[%s3314_s22 + $0x30] sm:$0xff] %v1862_v25 }
 0x455   : > { %v2461_v43 = vpop.eup %2460 }
 0x456   : > { %v1839_v46 = vmul.f32 0.6931472, %v2461_v43  ;;  %v1809_v26 = vpop.xlane.xlu0 %1808 }
 0x457   : > { %2462 = vlog2.f32 %v1809_v26 }
 0x458   : > { %v1863_v49 = vsub.f32 %v3275_v40, %v1839_v46 }
 0x45a   : > { %1879 = vst [vmem:[%s3314_s22 + $0x38] sm:$0xff] %v1863_v49 }
 0x45d   : > { %v2463_v38 = vpop.eup %2462 }
 0x45e   : > { %v1841_v20 = vmul.f32 0.6931472, %v2463_v38  ;;  %v1811_v36 = vpop.xlane.xlu1 %1810 }
 0x45f   : > { %2464 = vlog2.f32 %v1811_v36 }
 0x460   : > { %v1864_v39 = vsub.f32 %v3279_v45, %v1841_v20 }
 0x462   : > { %1880 = vst [vmem:[%s3314_s22 + $0x40] sm:$0xff] %v1864_v39 }
 0x465   : > { %v2465_v54 = vpop.eup %2464 }
 0x466   : > { %v1843_v61 = vmul.f32 0.6931472, %v2465_v54  ;;  %v1813_v24 = vpop.xlane.xlu2 %1812 }
 0x467   : > { %2466 = vlog2.f32 %v1813_v24 }
 0x468   : > { %v1865_v7 = vsub.f32 %v3283_v22, %v1843_v61 }
 0x46a   : > { %1881 = vst [vmem:[%s3314_s22 + $0x48] sm:$0xff] %v1865_v7 }
 0x46d   : > { %v2467_v1 = vpop.eup %2466 }
 0x46e   : > { %v1845_v37 = vmul.f32 0.6931472, %v2467_v1  ;;  %v1815_v40 = vpop.xlane.xlu0 %1814 }
 0x46f   : > { %2468 = vlog2.f32 %v1815_v40 }
 0x470   : > { %v1866_v50 = vsub.f32 %v3287_v56, %v1845_v37 }
 0x472   : > { %1882 = vst [vmem:[%s3314_s22 + $0x50] sm:$0xff] %v1866_v50 }
 0x475   : > { %v2469_v52 = vpop.eup %2468 }
 0x476   : > { %v1847_v47 = vmul.f32 0.6931472, %v2469_v52  ;;  %v1817_v45 = vpop.xlane.xlu1 %1816 }
 0x477   : > { %2470 = vlog2.f32 %v1817_v45 }
 0x478   : > { %v1867_v4 = vsub.f32 %v3291_v51, %v1847_v47 }
 0x47a   : > { %1883 = vst [vmem:[%s3314_s22 + $0x58] sm:$0xff] %v1867_v4 }
 0x47d   : > { %v2471_v59 = vpop.eup %2470 }
 0x47e   : > { %v1849_v22 = vmul.f32 0.6931472, %v2471_v59  ;;  %v1819_v60 = vpop.xlane.xlu2 %1818 }
 0x47f   : > { %2472 = vlog2.f32 %v1819_v60 }
 0x480   : > { %v1868_v53 = vsub.f32 %v3295_v27, %v1849_v22 }
 0x482   : > { %1884 = vst [vmem:[%s3314_s22 + $0x60] sm:$0xff] %v1868_v53 }
 0x485   : > { %v2473_v56 = vpop.eup %2472 }
 0x486   : > { %v1851_v55 = vmul.f32 0.6931472, %v2473_v56  ;;  %v1821_v3 = vpop.xlane.xlu0 %1820 }
 0x487   : > { %2474 = vlog2.f32 %v1821_v3 }
 0x488   : > { %v1869_v32 = vsub.f32 %v3299_v57, %v1851_v55 }
 0x48a   : > { %1885 = vst [vmem:[%s3314_s22 + $0x68] sm:$0xff] %v1869_v32 }
 0x48d   : > { %v2475_v51 = vpop.eup %2474 }
 0x48e   : > { %v1853_v5 = vmul.f32 0.6931472, %v2475_v51  ;;  %v1823_v6 = vpop.xlane.xlu1 %1822 }
 0x48f   : > { %2476 = vlog2.f32 %v1823_v6 }
 0x490   : > { %v1870_v17 = vsub.f32 %v3303_v10, %v1853_v5 }
 0x492   : > { %1886 = vst [vmem:[%s3314_s22 + $0x70] sm:$0xff] %v1870_v17 }
 0x495   : > { %v2477_v27 = vpop.eup %2476 }
 0x496   : > { %v1855_v57 = vmul.f32 0.6931472, %v2477_v27 }
 0x498   : > { %v1871_v30 = vsub.f32 %v3307_v2, %v1855_v57 }
 0x49a   : > { %1887 = vst [vmem:[%s3314_s22 + $0x78] sm:$0xff] %v1871_v30 }
 0x49b   : > { %2505 = shalt.err (!%p2502_p3)
}
 0x49c   : > { %s2542_s16 = smov 128   ;;  %s2543_s22 = smov 8  }
 0x49d   : > { %2369 = dma.vmem_to_hbm [thread:$0]  (%p2632_p5), %s1902_s27, 2048, %s1904_s28, %s1889_s13, %s2542_s16, %s2542_s16, %s2543_s22  }
 0x49e PF: > { %p2375_p4 = scmp.ge.s32.totalorder %s2540_s12, 2  ;;  %s1918_s26 = sand.u32 1, %s2528_s30  }
 0x49f   : > { %s1919_s21 = scalar_lea.sflag [#allocation3], %s1918_s26 }
 0x4a0   : > { %p2372_p7 = pnand %p2375_p4, %p2636_p6 }
 0x4a2   : > { %p2373_p8 = pneg %p2372_p7 }
 0x4a4   : > { %2523 = dma.done.wait (%p2373_p8), %s1919_s21, 2048  }
 0x4a5   : > { %2525 = vsyncadd (%p2373_p8), %s1919_s21, 4294965248  ;;  %p19_p9 = scmp.ge.s32.totalorder %s2619_s15, 4   ;;  %s3393_s30 = smov %s2532_s10 }
 0x4a6   : > { %s3394_s10 = smov %s2536_s11  ;;  %s3395_s11 = smov %s2630_s18 }
 0x4a7   : > { %s3396_s12 = smov %s2619_s15  ;;  %21 = sbr.rel (!%p19_p9) target bundleno = 3 (0x3), region = 91 }
 0x4ac   :  { %1925 = vsyncpa [#allocation3], 1 }
 0x4ad   :  { %1927 = vsyncpa [#allocation3 + $0x1], 1 }

</bundles_post_ra>
